<compile_context>
chip_gen: v7x
topology: tpu7x:2x2x1
jax: 0.10.0
libtpu: 0.0.40
codegen_flags: <defaults>
</compile_context>

<pallas_src>
import functools

import jax
import jax.numpy as jnp
from jax.experimental import pallas as pl
from jax.experimental.pallas import tpu as pltpu

# MXU-operand dtype only; LayerNorm stats, softmax, residual adds stay float32.
MXU_DTYPE = jnp.bfloat16

# Packed per-layer C-sized vectors: bq, bk, bv, bo, b2, ln1_g, ln1_b, ln2_g, ln2_b
_NUM_PACKED_VECS = 9


# ----------------------------- kernel ----------------------------------------

def _layer_norm(x, g, b, eps=1e-5):
    mean = jnp.mean(x, axis=-1, keepdims=True)
    var = jnp.mean((x - mean) ** 2, axis=-1, keepdims=True)
    return (x - mean) * jax.lax.rsqrt(var + eps) * g + b


def _make_fused_kernel(num_heads, bblk, seq_len, write_every_layer):
    """One grid step = (batch block b, encoder layer l)."""
    H = num_heads

    def kernel(x_in_ref, bias_ref, wqkv_ref, wo_ref, w1_ref, w2_ref,
               vecs_ref, b1_ref, out_ref, x_sc, ctx_sc):
        layer = pl.program_id(1)

        # Load the embedding block into the resident activation scratch once
        # per batch block (layer axis is the inner, "arbitrary" grid axis).
        @pl.when(layer == 0)
        def _():
            x_sc[...] = x_in_ref[...].reshape(x_sc.shape)

        x = x_sc[...]                              # (R, C) f32, R = Bblk*T
        R, C = x.shape
        Dh = C // H

        vecs = vecs_ref[...]                       # (9, C) f32, one DMA per layer
        bq, bk, bv = vecs[0:1], vecs[1:2], vecs[2:3]
        bo, b2 = vecs[3:4], vecs[4:5]
        ln1g, ln1b = vecs[5:6], vecs[6:7]
        ln2g, ln2b = vecs[7:8], vecs[8:9]

        # --- fused QKV projection: one (R, C) x (C, 3C) MXU matmul ---
        xm = x.astype(MXU_DTYPE)
        qkv = jnp.dot(xm, wqkv_ref[...], preferred_element_type=jnp.float32)
        q = qkv[:, 0:C] + bq           # 1/sqrt(Dh) folded into wq / bq (pack time)
        k = qkv[:, C:2 * C] + bk
        v = qkv[:, 2 * C:3 * C] + bv

        key_bias = bias_ref[...]                   # (Bblk, 1, T): 0 / -1e9 at pads

        # --- multi-head self-attention, batched over the Bblk batch elements ---
        for h in range(H):                         # static unroll (small H)
            sl = slice(h * Dh, (h + 1) * Dh)
            qh = q[:, sl].reshape(bblk, seq_len, Dh).astype(MXU_DTYPE)
            kh = k[:, sl].reshape(bblk, seq_len, Dh).astype(MXU_DTYPE)
            vh = v[:, sl].reshape(bblk, seq_len, Dh).astype(MXU_DTYPE)
            scores = jnp.einsum('bqd,bkd->bqk', qh, kh,
                                preferred_element_type=jnp.float32)   # (Bblk,T,T)
            scores = scores + key_bias                                 # additive mask
            scores = scores - jnp.max(scores, axis=-1, keepdims=True)
            p = jnp.exp(scores)
            denom = jnp.sum(p, axis=-1, keepdims=True)
            p = p * pl.reciprocal(denom, approx=False)
            ctxh = jnp.einsum('bqk,bkd->bqd', p.astype(MXU_DTYPE), vh,
                              preferred_element_type=jnp.float32)      # (Bblk,T,Dh)
            # write head context into the preallocated ctx scratch (no concat)
            ctx_sc[:, sl] = ctxh.reshape(R, Dh)

        attn = (jnp.dot(ctx_sc[...].astype(MXU_DTYPE), wo_ref[...],
                        preferred_element_type=jnp.float32) + bo)

        h1 = _layer_norm(x + attn, ln1g, ln1b)     # residual + LN (post-norm)

        # --- feed-forward ---
        ff = jnp.maximum(
            jnp.dot(h1.astype(MXU_DTYPE), w1_ref[...],
                    preferred_element_type=jnp.float32) + b1_ref[...], 0.0)
        ff = (jnp.dot(ff.astype(MXU_DTYPE), w2_ref[...],
                      preferred_element_type=jnp.float32) + b2)

        h2 = _layer_norm(h1 + ff, ln2g, ln2b)      # residual + LN

        x_sc[...] = h2                             # carry activations to next layer

        if write_every_layer:
            out_ref[...] = h2.reshape(out_ref.shape).astype(out_ref.dtype)
        else:
            # Output block is resident across the layer axis: only write (and
            # hence only write back to HBM) the final layer's activations.
            @pl.when(layer == pl.num_programs(1) - 1)
            def _():
                out_ref[...] = h2.reshape(out_ref.shape).astype(out_ref.dtype)

    return kernel


def _choose_batch_block(batch, seq_len, target_rows=256):
    """Largest divisor of `batch` whose Bblk*T stays near the MXU-height target."""
    best = 1
    for cand in range(1, batch + 1):
        if batch % cand == 0 and cand * seq_len <= max(target_rows, seq_len):
            best = cand
    return best


def _vmem_limit_bytes():
    # ~3/4 of physical VMEM: ~96 MiB on v5e/v6e (128 MiB), ~48 MiB on v7x (64 MiB),
    # so full per-layer weight sets can be double-buffered behind compute.
    try:
        cap = int(pltpu.get_tpu_info().vmem_capacity_bytes)
    except Exception:
        cap = 64 * 1024 * 1024
    return max(32 * 1024 * 1024, (3 * cap) // 4)


def fused_encoder_layers(x_btc, key_bias, packed, num_heads, *, last_state_only=False):
    """x_btc: (B, T, C) f32, key_bias: (B, 1, T) f32 additive mask.
    Returns (L, B, T, C) f32 (all layer outputs) or (B, T, C) f32 (last only)."""
    B, T, C = x_btc.shape
    L = packed["wqkv"].shape[0]
    F = packed["w1"].shape[-1]

    bblk = _choose_batch_block(B, T)
    nb = B // bblk

    xmap = lambda b, l: (b, 0, 0)      # per-batch-block, resident across layers
    wmap = lambda b, l: (l, 0, 0)      # per-layer stacked weights (prefetched)

    in_specs = [
        pl.BlockSpec((bblk, T, C), xmap),                  # embeddings
        pl.BlockSpec((bblk, 1, T), xmap),                  # additive key-pad bias
        pl.BlockSpec((None, C, 3 * C), wmap),              # fused Wqkv (bf16)
        pl.BlockSpec((None, C, C), wmap),                  # Wo (bf16)
        pl.BlockSpec((None, C, F), wmap),                  # W1 (bf16)
        pl.BlockSpec((None, F, C), wmap),                  # W2 (bf16)
        pl.BlockSpec((None, _NUM_PACKED_VECS, C), wmap),   # packed bias/LN vectors
        pl.BlockSpec((None, 1, F), wmap),                  # b1
    ]

    if last_state_only:
        out_shape = jax.ShapeDtypeStruct((B, T, C), jnp.float32)
        out_spec = pl.BlockSpec((bblk, T, C), lambda b, l: (b, 0, 0))
    else:
        out_shape = jax.ShapeDtypeStruct((L, B, T, C), jnp.float32)
        out_spec = pl.BlockSpec((None, bblk, T, C), lambda b, l: (l, b, 0, 0))

    # Advisory cost estimate so XLA schedules the custom call sensibly.
    flops = L * B * (2 * T * C * 3 * C + 4 * T * T * C + 2 * T * C * C + 4 * T * C * F)
    transcendentals = L * B * (num_heads * T * T + 4 * T)
    weight_bytes_layer = ((3 * C * C + C * C + 2 * C * F) * 2
                          + (_NUM_PACKED_VECS * C + F) * 4)
    bytes_accessed = (nb * L * weight_bytes_layer
                      + B * T * C * 4 + B * T * 4
                      + (1 if last_state_only else L) * B * T * C * 4)
    cost = pl.CostEstimate(flops=int(flops), transcendentals=int(transcendentals),
                           bytes_accessed=int(bytes_accessed))

    grid_spec = pltpu.PrefetchScalarGridSpec(
        num_scalar_prefetch=0,
        grid=(nb, L),
        in_specs=in_specs,
        out_specs=out_spec,
        scratch_shapes=[pltpu.VMEM((bblk * T, C), jnp.float32),   # resident acts
                        pltpu.VMEM((bblk * T, C), jnp.float32)],  # head-context buf
    )

    return pl.pallas_call(
        _make_fused_kernel(num_heads, bblk, T, not last_state_only),
        out_shape=out_shape,
        grid_spec=grid_spec,
        compiler_params=pltpu.CompilerParams(
            dimension_semantics=("parallel", "arbitrary"),
            vmem_limit_bytes=_vmem_limit_bytes()),
        cost_estimate=cost,
    )(x_btc, key_bias, packed["wqkv"], packed["wo"], packed["w1"], packed["w2"],
      packed["vecs"], packed["b1"])


# --------------------------- parameter setup ----------------------------------

def init_params(key, vocab_size, embed_dim, ffn_dim, num_layers):
    """Module-like f32 parameters (weights stored as (in, out) for x @ W)."""
    C, F, L = embed_dim, ffn_dim, num_layers

    def nrm(k, shape, s=0.02):
        return (s * jax.random.normal(k, shape)).astype(jnp.float32)

    ks = jax.random.split(key, 14)
    return {
        "embed": nrm(ks[0], (vocab_size, C), 0.1),
        "wq": nrm(ks[1], (L, C, C)), "wk": nrm(ks[2], (L, C, C)),
        "wv": nrm(ks[3], (L, C, C)), "wo": nrm(ks[4], (L, C, C)),
        "w1": nrm(ks[5], (L, C, F)), "w2": nrm(ks[6], (L, F, C)),
        "bq": nrm(ks[7], (L, C), 0.01), "bk": nrm(ks[8], (L, C), 0.01),
        "bv": nrm(ks[9], (L, C), 0.01), "bo": nrm(ks[10], (L, C), 0.01),
        "b1": nrm(ks[11], (L, F), 0.01), "b2": nrm(ks[12], (L, C), 0.01),
        "ln1_g": 1.0 + nrm(ks[13], (L, C), 0.01),
        "ln1_b": jnp.zeros((L, C), jnp.float32),
        "ln2_g": jnp.ones((L, C), jnp.float32),
        "ln2_b": jnp.zeros((L, C), jnp.float32),
    }


def pack_params(params, num_heads):
    """One-time parameter prep: fold 1/sqrt(Dh) into Wq/bq, fuse QKV weights,
    pack the small per-layer vectors, cast MXU operands to bf16."""
    C = params["wq"].shape[-1]
    Dh = C // num_heads
    scale = 1.0 / float(Dh) ** 0.5

    wqkv = jnp.concatenate(
        [params["wq"] * scale, params["wk"], params["wv"]], axis=-1)  # (L, C, 3C)
    vecs = jnp.stack(
        [params["bq"] * scale, params["bk"], params["bv"], params["bo"],
         params["b2"], params["ln1_g"], params["ln1_b"],
         params["ln2_g"], params["ln2_b"]], axis=1)                    # (L, 9, C)
    return {
        "embed": params["embed"].astype(jnp.float32),
        "wqkv": wqkv.astype(MXU_DTYPE),
        "wo": params["wo"].astype(MXU_DTYPE),
        "w1": params["w1"].astype(MXU_DTYPE),
        "w2": params["w2"].astype(MXU_DTYPE),
        "vecs": vecs.astype(jnp.float32),
        "b1": params["b1"][:, None, :].astype(jnp.float32),           # (L, 1, F)
    }


# ------------------------------ forward ----------------------------------------

def transformer_encoder_forward(tokens, packed, padding_idx, num_heads,
                                last_state_only=False):
    """Mirrors TransformerEncoder.forward (eval mode, paths=None, rel=None)."""
    mask = (tokens == padding_idx).astype(jnp.float32)            # (B, T)

    x = packed["embed"][tokens]                                   # (B, T, C) gather (glue)
    # dropout: identity in eval mode.
    # Unconditional zeroing of padded embeddings (no host-sync `any()`); with no
    # padding this is a multiply by 1.0, matching padding_mask=None.
    x = x * (1.0 - mask[..., None])

    # additive attention bias: 0 for real key tokens, -1e9 for padded keys
    key_bias = (mask * (-1e9))[:, None, :]                        # (B, 1, T)

    if last_state_only:
        final = fused_encoder_layers(x, key_bias, packed, num_heads,
                                     last_state_only=True)        # (B, T, C)
        final_tbc = jnp.transpose(final, (1, 0, 2))               # (T, B, C)
        return [final_tbc], final_tbc[0]

    layer_outs = fused_encoder_layers(x, key_bias, packed, num_heads,
                                      last_state_only=False)      # (L, B, T, C)

    # layout plumbing back to the module's (T, B, C) convention (wrapper-side)
    x0_tbc = jnp.transpose(x, (1, 0, 2))                          # (T, B, C)
    outs_tbc = jnp.transpose(layer_outs, (0, 2, 1, 3))            # (L, T, B, C)

    L = layer_outs.shape[0]
    inner_states = [x0_tbc] + [outs_tbc[l] for l in range(L)]
    sentence_rep = outs_tbc[L - 1][0, :, :]                       # (B, C)
    return inner_states, sentence_rep


# -------------------------------- main -----------------------------------------

if __name__ == "__main__":
    PADDING_IDX = 0
    VOCAB_SIZE = 50
    EMBED_DIM = 32
    NUM_HEADS = 4
    NUM_LAYERS = 2
    FFN_DIM = 4 * EMBED_DIM
    B, T = 2, 8

    key = jax.random.PRNGKey(0)
    k_tok, k_par = jax.random.split(key)

    tokens = jax.random.randint(k_tok, (B, T), 1, VOCAB_SIZE, dtype=jnp.int32)
    tokens = tokens.at[0, -2:].set(PADDING_IDX)        # exercise the padding mask

    raw_params = init_params(k_par, VOCAB_SIZE, EMBED_DIM, FFN_DIM, NUM_LAYERS)
    packed = pack_params(raw_params, NUM_HEADS)        # one-time prep (scale fold, QKV fuse)

    fwd = jax.jit(functools.partial(
        transformer_encoder_forward,
        padding_idx=PADDING_IDX, num_heads=NUM_HEADS, last_state_only=False))
    inner_states, sentence_rep = fwd(tokens, packed)

    jax.block_until_ready(sentence_rep)
    for s in inner_states:
        jax.block_until_ready(s)

    fwd_last = jax.jit(functools.partial(
        transformer_encoder_forward,
        padding_idx=PADDING_IDX, num_heads=NUM_HEADS, last_state_only=True))
    last_states, sentence_rep_last = fwd_last(tokens, packed)
    jax.block_until_ready(sentence_rep_last)

    assert sentence_rep.shape == (B, EMBED_DIM)
    assert len(inner_states) == NUM_LAYERS + 1
    assert all(s.shape == (T, B, EMBED_DIM) for s in inner_states)
    assert bool(jnp.all(jnp.isfinite(sentence_rep)))
    assert all(bool(jnp.all(jnp.isfinite(s))) for s in inner_states)
    # last_state_only path must agree with the final inner state / sentence rep
    assert last_states[0].shape == (T, B, EMBED_DIM)
    assert bool(jnp.allclose(last_states[0], inner_states[-1], atol=1e-5, rtol=1e-5))
    assert bool(jnp.allclose(sentence_rep_last, sentence_rep, atol=1e-5, rtol=1e-5))
    print("KERNEL_OK")
</pallas_src>

<mosaic_0001>
module attributes {stable_mosaic.version = 11 : i64} {
  func.func @kernel(%arg0: i32, %arg1: i32, %arg2: memref<2x8x32xf32, #tpu.memory_space<vmem>>, %arg3: memref<2x1x8xf32, #tpu.memory_space<vmem>>, %arg4: memref<1x32x96xbf16, #tpu.memory_space<vmem>>, %arg5: memref<1x32x32xbf16, #tpu.memory_space<vmem>>, %arg6: memref<1x32x128xbf16, #tpu.memory_space<vmem>>, %arg7: memref<1x128x32xbf16, #tpu.memory_space<vmem>>, %arg8: memref<1x9x32xf32, #tpu.memory_space<vmem>>, %arg9: memref<1x1x128xf32, #tpu.memory_space<vmem>>, %arg10: memref<1x2x8x32xf32, #tpu.memory_space<vmem>>, %arg11: memref<16x32xf32, #tpu.memory_space<vmem>>, %arg12: memref<16x32xf32, #tpu.memory_space<vmem>>) attributes {dimension_semantics = [#tpu.dimension_semantics<parallel>, #tpu.dimension_semantics<arbitrary>], iteration_bounds = array<i64: 1, 2>, scalar_prefetch = 0 : i64, scratch_operands = 2 : i64, tpu.core_type = #tpu.core_type<tc>, window_params = [{transform_indices = @transform_0, window_bounds = array<i64: 2, 8, 32>}, {transform_indices = @transform_1, window_bounds = array<i64: 2, 1, 8>}, {transform_indices = @transform_2, window_bounds = array<i64: 1, 32, 96>}, {transform_indices = @transform_3, window_bounds = array<i64: 1, 32, 32>}, {transform_indices = @transform_4, window_bounds = array<i64: 1, 32, 128>}, {transform_indices = @transform_5, window_bounds = array<i64: 1, 128, 32>}, {transform_indices = @transform_6, window_bounds = array<i64: 1, 9, 32>}, {transform_indices = @transform_7, window_bounds = array<i64: 1, 1, 128>}, {transform_indices = @transform_8, window_bounds = array<i64: 1, 2, 8, 32>}]} {
    %c0_i32 = arith.constant 0 : i32
    %0 = arith.cmpi eq, %arg1, %c0_i32 : i32
    %1 = arith.extui %0 : i1 to i32
    %c0_i32_0 = arith.constant 0 : i32
    %2 = arith.cmpi ne, %1, %c0_i32_0 : i32
    scf.if %2 {
      %c0_66 = arith.constant 0 : index
      %c0_67 = arith.constant 0 : index
      %c0_68 = arith.constant 0 : index
      %207 = vector.load %arg2[%c0_66, %c0_67, %c0_68] : memref<2x8x32xf32, #tpu.memory_space<vmem>>, vector<2x8x32xf32>
      %208 = vector.shape_cast %207 : vector<2x8x32xf32> to vector<16x32xf32>
      %c0_69 = arith.constant 0 : index
      %c0_70 = arith.constant 0 : index
      %209 = vector.load %arg11[%c0_69, %c0_70] : memref<16x32xf32, #tpu.memory_space<vmem>>, vector<16x32xf32>
      tpu.vector_store %arg11[%c0_69, %c0_70], %208 {strides = array<i32>} : memref<16x32xf32, #tpu.memory_space<vmem>>, vector<16x32xf32>,
    } else {
    }
    %c0 = arith.constant 0 : index
    %c0_1 = arith.constant 0 : index
    %3 = vector.load %arg11[%c0, %c0_1] : memref<16x32xf32, #tpu.memory_space<vmem>>, vector<16x32xf32>
    %c0_2 = arith.constant 0 : index
    %c0_3 = arith.constant 0 : index
    %c0_4 = arith.constant 0 : index
    %4 = vector.load %arg8[%c0_2, %c0_3, %c0_4] : memref<1x9x32xf32, #tpu.memory_space<vmem>>, vector<1x9x32xf32>
    %5 = vector.shape_cast %4 : vector<1x9x32xf32> to vector<9x32xf32>
    %6 = vector.extract_strided_slice %5 {offsets = [0, 0], sizes = [1, 32], strides = [1, 1]} : vector<9x32xf32> to vector<1x32xf32>
    %7 = vector.extract_strided_slice %5 {offsets = [1, 0], sizes = [1, 32], strides = [1, 1]} : vector<9x32xf32> to vector<1x32xf32>
    %8 = vector.extract_strided_slice %5 {offsets = [2, 0], sizes = [1, 32], strides = [1, 1]} : vector<9x32xf32> to vector<1x32xf32>
    %9 = vector.extract_strided_slice %5 {offsets = [3, 0], sizes = [1, 32], strides = [1, 1]} : vector<9x32xf32> to vector<1x32xf32>
    %10 = vector.extract_strided_slice %5 {offsets = [4, 0], sizes = [1, 32], strides = [1, 1]} : vector<9x32xf32> to vector<1x32xf32>
    %11 = vector.extract_strided_slice %5 {offsets = [5, 0], sizes = [1, 32], strides = [1, 1]} : vector<9x32xf32> to vector<1x32xf32>
    %12 = vector.extract_strided_slice %5 {offsets = [6, 0], sizes = [1, 32], strides = [1, 1]} : vector<9x32xf32> to vector<1x32xf32>
    %13 = vector.extract_strided_slice %5 {offsets = [7, 0], sizes = [1, 32], strides = [1, 1]} : vector<9x32xf32> to vector<1x32xf32>
    %14 = vector.extract_strided_slice %5 {offsets = [8, 0], sizes = [1, 32], strides = [1, 1]} : vector<9x32xf32> to vector<1x32xf32>
    %15 = arith.truncf %3 : vector<16x32xf32> to vector<16x32xbf16>
    %c0_5 = arith.constant 0 : index
    %c0_6 = arith.constant 0 : index
    %c0_7 = arith.constant 0 : index
    %16 = vector.load %arg4[%c0_5, %c0_6, %c0_7] : memref<1x32x96xbf16, #tpu.memory_space<vmem>>, vector<1x32x96xbf16>
    %17 = vector.shape_cast %16 : vector<1x32x96xbf16> to vector<32x96xbf16>
    %cst = arith.constant dense<0.000000e+00> : vector<16x96xf32>
    %18 = tpu.matmul %15, %17, %cst {dimension_numbers = #tpu.dot_dimension_numbers<[1], [0], [0], [1], [0, 0, 1, 1], [], []>} : vector<16x32xbf16>, vector<32x96xbf16>, vector<16x96xf32> -> vector<16x96xf32>
    %19 = vector.extract_strided_slice %18 {offsets = [0, 0], sizes = [16, 32], strides = [1, 1]} : vector<16x96xf32> to vector<16x32xf32>
    %20 = vector.broadcast %6 : vector<1x32xf32> to vector<16x32xf32>
    %21 = arith.addf %19, %20 : vector<16x32xf32>
    %22 = vector.extract_strided_slice %18 {offsets = [0, 32], sizes = [16, 32], strides = [1, 1]} : vector<16x96xf32> to vector<16x32xf32>
    %23 = vector.broadcast %7 : vector<1x32xf32> to vector<16x32xf32>
    %24 = arith.addf %22, %23 : vector<16x32xf32>
    %25 = vector.extract_strided_slice %18 {offsets = [0, 64], sizes = [16, 32], strides = [1, 1]} : vector<16x96xf32> to vector<16x32xf32>
    %26 = vector.broadcast %8 : vector<1x32xf32> to vector<16x32xf32>
    %27 = arith.addf %25, %26 : vector<16x32xf32>
    %c0_8 = arith.constant 0 : index
    %c0_9 = arith.constant 0 : index
    %c0_10 = arith.constant 0 : index
    %28 = vector.load %arg3[%c0_8, %c0_9, %c0_10] : memref<2x1x8xf32, #tpu.memory_space<vmem>>, vector<2x1x8xf32>
    %29 = vector.extract_strided_slice %21 {offsets = [0, 0], sizes = [16, 8], strides = [1, 1]} : vector<16x32xf32> to vector<16x8xf32>
    %30 = vector.shape_cast %29 : vector<16x8xf32> to vector<2x8x8xf32>
    %31 = arith.truncf %30 : vector<2x8x8xf32> to vector<2x8x8xbf16>
    %32 = vector.extract_strided_slice %24 {offsets = [0, 0], sizes = [16, 8], strides = [1, 1]} : vector<16x32xf32> to vector<16x8xf32>
    %33 = vector.shape_cast %32 : vector<16x8xf32> to vector<2x8x8xf32>
    %34 = arith.truncf %33 : vector<2x8x8xf32> to vector<2x8x8xbf16>
    %35 = vector.extract_strided_slice %27 {offsets = [0, 0], sizes = [16, 8], strides = [1, 1]} : vector<16x32xf32> to vector<16x8xf32>
    %36 = vector.shape_cast %35 : vector<16x8xf32> to vector<2x8x8xf32>
    %37 = arith.truncf %36 : vector<2x8x8xf32> to vector<2x8x8xbf16>
    "tpu.trace_start"() <{level = 10 : i32, message = "bqd,bkd->bqk"}> : () -> ()
    %cst_11 = arith.constant dense<0.000000e+00> : vector<2x8x8xf32>
    %38 = tpu.matmul %31, %34, %cst_11 {dimension_numbers = #tpu.dot_dimension_numbers<[2], [2], [1], [1], [0, 0, 0, 1, 1, 1], [0], [0]>} : vector<2x8x8xbf16>, vector<2x8x8xbf16>, vector<2x8x8xf32> -> vector<2x8x8xf32>
    "tpu.trace_stop"() : () -> ()
    %39 = vector.broadcast %28 : vector<2x1x8xf32> to vector<2x8x8xf32>
    %40 = arith.addf %38, %39 : vector<2x8x8xf32>
    %cst_12 = arith.constant dense<0xFF800000> : vector<2x8xf32>
    %41 = vector.multi_reduction <maximumf>, %40, %cst_12 [2] : vector<2x8x8xf32> to vector<2x8xf32>
    %42 = vector.shape_cast %41 : vector<2x8xf32> to vector<2x8x1xf32>
    %43 = vector.broadcast %42 : vector<2x8x1xf32> to vector<2x8x8xf32>
    %44 = arith.subf %40, %43 : vector<2x8x8xf32>
    %45 = math.exp %44 : vector<2x8x8xf32>
    %cst_13 = arith.constant dense<0.000000e+00> : vector<2x8xf32>
    %46 = vector.multi_reduction <add>, %45, %cst_13 [2] : vector<2x8x8xf32> to vector<2x8xf32>
    %47 = vector.shape_cast %46 : vector<2x8xf32> to vector<2x8x1xf32>
    %48 = tpu.reciprocal %47 : vector<2x8x1xf32> -> vector<2x8x1xf32>
    %49 = vector.broadcast %48 : vector<2x8x1xf32> to vector<2x8x8xf32>
    %50 = arith.mulf %45, %49 : vector<2x8x8xf32>
    %51 = arith.truncf %50 : vector<2x8x8xf32> to vector<2x8x8xbf16>
    "tpu.trace_start"() <{level = 10 : i32, message = "bqk,bkd->bqd"}> : () -> ()
    %cst_14 = arith.constant dense<0.000000e+00> : vector<2x8x8xf32>
    %52 = tpu.matmul %51, %37, %cst_14 {dimension_numbers = #tpu.dot_dimension_numbers<[2], [1], [1], [2], [0, 0, 0, 1, 1, 2], [0], [0]>} : vector<2x8x8xbf16>, vector<2x8x8xbf16>, vector<2x8x8xf32> -> vector<2x8x8xf32>
    "tpu.trace_stop"() : () -> ()
    %53 = vector.shape_cast %52 : vector<2x8x8xf32> to vector<16x8xf32>
    %c0_15 = arith.constant 0 : index
    %c0_16 = arith.constant 0 : index
    %54 = vector.load %arg12[%c0_15, %c0_16] : memref<16x32xf32, #tpu.memory_space<vmem>>, vector<16x8xf32>
    tpu.vector_store %arg12[%c0_15, %c0_16], %53 {strides = array<i32>} : memref<16x32xf32, #tpu.memory_space<vmem>>, vector<16x8xf32>,
    %55 = vector.extract_strided_slice %21 {offsets = [0, 8], sizes = [16, 8], strides = [1, 1]} : vector<16x32xf32> to vector<16x8xf32>
    %56 = vector.shape_cast %55 : vector<16x8xf32> to vector<2x8x8xf32>
    %57 = arith.truncf %56 : vector<2x8x8xf32> to vector<2x8x8xbf16>
    %58 = vector.extract_strided_slice %24 {offsets = [0, 8], sizes = [16, 8], strides = [1, 1]} : vector<16x32xf32> to vector<16x8xf32>
    %59 = vector.shape_cast %58 : vector<16x8xf32> to vector<2x8x8xf32>
    %60 = arith.truncf %59 : vector<2x8x8xf32> to vector<2x8x8xbf16>
    %61 = vector.extract_strided_slice %27 {offsets = [0, 8], sizes = [16, 8], strides = [1, 1]} : vector<16x32xf32> to vector<16x8xf32>
    %62 = vector.shape_cast %61 : vector<16x8xf32> to vector<2x8x8xf32>
    %63 = arith.truncf %62 : vector<2x8x8xf32> to vector<2x8x8xbf16>
    "tpu.trace_start"() <{level = 10 : i32, message = "bqd,bkd->bqk"}> : () -> ()
    %cst_17 = arith.constant dense<0.000000e+00> : vector<2x8x8xf32>
    %64 = tpu.matmul %57, %60, %cst_17 {dimension_numbers = #tpu.dot_dimension_numbers<[2], [2], [1], [1], [0, 0, 0, 1, 1, 1], [0], [0]>} : vector<2x8x8xbf16>, vector<2x8x8xbf16>, vector<2x8x8xf32> -> vector<2x8x8xf32>
    "tpu.trace_stop"() : () -> ()
    %65 = vector.broadcast %28 : vector<2x1x8xf32> to vector<2x8x8xf32>
    %66 = arith.addf %64, %65 : vector<2x8x8xf32>
    %cst_18 = arith.constant dense<0xFF800000> : vector<2x8xf32>
    %67 = vector.multi_reduction <maximumf>, %66, %cst_18 [2] : vector<2x8x8xf32> to vector<2x8xf32>
    %68 = vector.shape_cast %67 : vector<2x8xf32> to vector<2x8x1xf32>
    %69 = vector.broadcast %68 : vector<2x8x1xf32> to vector<2x8x8xf32>
    %70 = arith.subf %66, %69 : vector<2x8x8xf32>
    %71 = math.exp %70 : vector<2x8x8xf32>
    %cst_19 = arith.constant dense<0.000000e+00> : vector<2x8xf32>
    %72 = vector.multi_reduction <add>, %71, %cst_19 [2] : vector<2x8x8xf32> to vector<2x8xf32>
    %73 = vector.shape_cast %72 : vector<2x8xf32> to vector<2x8x1xf32>
    %74 = tpu.reciprocal %73 : vector<2x8x1xf32> -> vector<2x8x1xf32>
    %75 = vector.broadcast %74 : vector<2x8x1xf32> to vector<2x8x8xf32>
    %76 = arith.mulf %71, %75 : vector<2x8x8xf32>
    %77 = arith.truncf %76 : vector<2x8x8xf32> to vector<2x8x8xbf16>
    "tpu.trace_start"() <{level = 10 : i32, message = "bqk,bkd->bqd"}> : () -> ()
    %cst_20 = arith.constant dense<0.000000e+00> : vector<2x8x8xf32>
    %78 = tpu.matmul %77, %63, %cst_20 {dimension_numbers = #tpu.dot_dimension_numbers<[2], [1], [1], [2], [0, 0, 0, 1, 1, 2], [0], [0]>} : vector<2x8x8xbf16>, vector<2x8x8xbf16>, vector<2x8x8xf32> -> vector<2x8x8xf32>
    "tpu.trace_stop"() : () -> ()
    %79 = vector.shape_cast %78 : vector<2x8x8xf32> to vector<16x8xf32>
    %c0_21 = arith.constant 0 : index
    %c8 = arith.constant 8 : index
    %80 = vector.load %arg12[%c0_21, %c8] : memref<16x32xf32, #tpu.memory_space<vmem>>, vector<16x8xf32>
    tpu.vector_store %arg12[%c0_21, %c8], %79 {strides = array<i32>} : memref<16x32xf32, #tpu.memory_space<vmem>>, vector<16x8xf32>,
    %81 = vector.extract_strided_slice %21 {offsets = [0, 16], sizes = [16, 8], strides = [1, 1]} : vector<16x32xf32> to vector<16x8xf32>
    %82 = vector.shape_cast %81 : vector<16x8xf32> to vector<2x8x8xf32>
    %83 = arith.truncf %82 : vector<2x8x8xf32> to vector<2x8x8xbf16>
    %84 = vector.extract_strided_slice %24 {offsets = [0, 16], sizes = [16, 8], strides = [1, 1]} : vector<16x32xf32> to vector<16x8xf32>
    %85 = vector.shape_cast %84 : vector<16x8xf32> to vector<2x8x8xf32>
    %86 = arith.truncf %85 : vector<2x8x8xf32> to vector<2x8x8xbf16>
    %87 = vector.extract_strided_slice %27 {offsets = [0, 16], sizes = [16, 8], strides = [1, 1]} : vector<16x32xf32> to vector<16x8xf32>
    %88 = vector.shape_cast %87 : vector<16x8xf32> to vector<2x8x8xf32>
    %89 = arith.truncf %88 : vector<2x8x8xf32> to vector<2x8x8xbf16>
    "tpu.trace_start"() <{level = 10 : i32, message = "bqd,bkd->bqk"}> : () -> ()
    %cst_22 = arith.constant dense<0.000000e+00> : vector<2x8x8xf32>
    %90 = tpu.matmul %83, %86, %cst_22 {dimension_numbers = #tpu.dot_dimension_numbers<[2], [2], [1], [1], [0, 0, 0, 1, 1, 1], [0], [0]>} : vector<2x8x8xbf16>, vector<2x8x8xbf16>, vector<2x8x8xf32> -> vector<2x8x8xf32>
    "tpu.trace_stop"() : () -> ()
    %91 = vector.broadcast %28 : vector<2x1x8xf32> to vector<2x8x8xf32>
    %92 = arith.addf %90, %91 : vector<2x8x8xf32>
    %cst_23 = arith.constant dense<0xFF800000> : vector<2x8xf32>
    %93 = vector.multi_reduction <maximumf>, %92, %cst_23 [2] : vector<2x8x8xf32> to vector<2x8xf32>
    %94 = vector.shape_cast %93 : vector<2x8xf32> to vector<2x8x1xf32>
    %95 = vector.broadcast %94 : vector<2x8x1xf32> to vector<2x8x8xf32>
    %96 = arith.subf %92, %95 : vector<2x8x8xf32>
    %97 = math.exp %96 : vector<2x8x8xf32>
    %cst_24 = arith.constant dense<0.000000e+00> : vector<2x8xf32>
    %98 = vector.multi_reduction <add>, %97, %cst_24 [2] : vector<2x8x8xf32> to vector<2x8xf32>
    %99 = vector.shape_cast %98 : vector<2x8xf32> to vector<2x8x1xf32>
    %100 = tpu.reciprocal %99 : vector<2x8x1xf32> -> vector<2x8x1xf32>
    %101 = vector.broadcast %100 : vector<2x8x1xf32> to vector<2x8x8xf32>
    %102 = arith.mulf %97, %101 : vector<2x8x8xf32>
    %103 = arith.truncf %102 : vector<2x8x8xf32> to vector<2x8x8xbf16>
    "tpu.trace_start"() <{level = 10 : i32, message = "bqk,bkd->bqd"}> : () -> ()
    %cst_25 = arith.constant dense<0.000000e+00> : vector<2x8x8xf32>
    %104 = tpu.matmul %103, %89, %cst_25 {dimension_numbers = #tpu.dot_dimension_numbers<[2], [1], [1], [2], [0, 0, 0, 1, 1, 2], [0], [0]>} : vector<2x8x8xbf16>, vector<2x8x8xbf16>, vector<2x8x8xf32> -> vector<2x8x8xf32>
    "tpu.trace_stop"() : () -> ()
    %105 = vector.shape_cast %104 : vector<2x8x8xf32> to vector<16x8xf32>
    %c0_26 = arith.constant 0 : index
    %c16 = arith.constant 16 : index
    %106 = vector.load %arg12[%c0_26, %c16] : memref<16x32xf32, #tpu.memory_space<vmem>>, vector<16x8xf32>
    tpu.vector_store %arg12[%c0_26, %c16], %105 {strides = array<i32>} : memref<16x32xf32, #tpu.memory_space<vmem>>, vector<16x8xf32>,
    %107 = vector.extract_strided_slice %21 {offsets = [0, 24], sizes = [16, 8], strides = [1, 1]} : vector<16x32xf32> to vector<16x8xf32>
    %108 = vector.shape_cast %107 : vector<16x8xf32> to vector<2x8x8xf32>
    %109 = arith.truncf %108 : vector<2x8x8xf32> to vector<2x8x8xbf16>
    %110 = vector.extract_strided_slice %24 {offsets = [0, 24], sizes = [16, 8], strides = [1, 1]} : vector<16x32xf32> to vector<16x8xf32>
    %111 = vector.shape_cast %110 : vector<16x8xf32> to vector<2x8x8xf32>
    %112 = arith.truncf %111 : vector<2x8x8xf32> to vector<2x8x8xbf16>
    %113 = vector.extract_strided_slice %27 {offsets = [0, 24], sizes = [16, 8], strides = [1, 1]} : vector<16x32xf32> to vector<16x8xf32>
    %114 = vector.shape_cast %113 : vector<16x8xf32> to vector<2x8x8xf32>
    %115 = arith.truncf %114 : vector<2x8x8xf32> to vector<2x8x8xbf16>
    "tpu.trace_start"() <{level = 10 : i32, message = "bqd,bkd->bqk"}> : () -> ()
    %cst_27 = arith.constant dense<0.000000e+00> : vector<2x8x8xf32>
    %116 = tpu.matmul %109, %112, %cst_27 {dimension_numbers = #tpu.dot_dimension_numbers<[2], [2], [1], [1], [0, 0, 0, 1, 1, 1], [0], [0]>} : vector<2x8x8xbf16>, vector<2x8x8xbf16>, vector<2x8x8xf32> -> vector<2x8x8xf32>
    "tpu.trace_stop"() : () -> ()
    %117 = vector.broadcast %28 : vector<2x1x8xf32> to vector<2x8x8xf32>
    %118 = arith.addf %116, %117 : vector<2x8x8xf32>
    %cst_28 = arith.constant dense<0xFF800000> : vector<2x8xf32>
    %119 = vector.multi_reduction <maximumf>, %118, %cst_28 [2] : vector<2x8x8xf32> to vector<2x8xf32>
    %120 = vector.shape_cast %119 : vector<2x8xf32> to vector<2x8x1xf32>
    %121 = vector.broadcast %120 : vector<2x8x1xf32> to vector<2x8x8xf32>
    %122 = arith.subf %118, %121 : vector<2x8x8xf32>
    %123 = math.exp %122 : vector<2x8x8xf32>
    %cst_29 = arith.constant dense<0.000000e+00> : vector<2x8xf32>
    %124 = vector.multi_reduction <add>, %123, %cst_29 [2] : vector<2x8x8xf32> to vector<2x8xf32>
    %125 = vector.shape_cast %124 : vector<2x8xf32> to vector<2x8x1xf32>
    %126 = tpu.reciprocal %125 : vector<2x8x1xf32> -> vector<2x8x1xf32>
    %127 = vector.broadcast %126 : vector<2x8x1xf32> to vector<2x8x8xf32>
    %128 = arith.mulf %123, %127 : vector<2x8x8xf32>
    %129 = arith.truncf %128 : vector<2x8x8xf32> to vector<2x8x8xbf16>
    "tpu.trace_start"() <{level = 10 : i32, message = "bqk,bkd->bqd"}> : () -> ()
    %cst_30 = arith.constant dense<0.000000e+00> : vector<2x8x8xf32>
    %130 = tpu.matmul %129, %115, %cst_30 {dimension_numbers = #tpu.dot_dimension_numbers<[2], [1], [1], [2], [0, 0, 0, 1, 1, 2], [0], [0]>} : vector<2x8x8xbf16>, vector<2x8x8xbf16>, vector<2x8x8xf32> -> vector<2x8x8xf32>
    "tpu.trace_stop"() : () -> ()
    %131 = vector.shape_cast %130 : vector<2x8x8xf32> to vector<16x8xf32>
    %c0_31 = arith.constant 0 : index
    %c24 = arith.constant 24 : index
    %132 = vector.load %arg12[%c0_31, %c24] : memref<16x32xf32, #tpu.memory_space<vmem>>, vector<16x8xf32>
    tpu.vector_store %arg12[%c0_31, %c24], %131 {strides = array<i32>} : memref<16x32xf32, #tpu.memory_space<vmem>>, vector<16x8xf32>,
    %c0_32 = arith.constant 0 : index
    %c0_33 = arith.constant 0 : index
    %133 = vector.load %arg12[%c0_32, %c0_33] : memref<16x32xf32, #tpu.memory_space<vmem>>, vector<16x32xf32>
    %134 = arith.truncf %133 : vector<16x32xf32> to vector<16x32xbf16>
    %c0_34 = arith.constant 0 : index
    %c0_35 = arith.constant 0 : index
    %c0_36 = arith.constant 0 : index
    %135 = vector.load %arg5[%c0_34, %c0_35, %c0_36] : memref<1x32x32xbf16, #tpu.memory_space<vmem>>, vector<1x32x32xbf16>
    %136 = vector.shape_cast %135 : vector<1x32x32xbf16> to vector<32x32xbf16>
    %cst_37 = arith.constant dense<0.000000e+00> : vector<16x32xf32>
    %137 = tpu.matmul %134, %136, %cst_37 {dimension_numbers = #tpu.dot_dimension_numbers<[1], [0], [0], [1], [0, 0, 1, 1], [], []>} : vector<16x32xbf16>, vector<32x32xbf16>, vector<16x32xf32> -> vector<16x32xf32>
    %138 = vector.broadcast %9 : vector<1x32xf32> to vector<16x32xf32>
    %139 = arith.addf %137, %138 : vector<16x32xf32>
    %140 = arith.addf %3, %139 : vector<16x32xf32>
    %cst_38 = arith.constant dense<0.000000e+00> : vector<16xf32>
    %141 = vector.multi_reduction <add>, %140, %cst_38 [1] : vector<16x32xf32> to vector<16xf32>
    %142 = vector.shape_cast %141 : vector<16xf32> to vector<16x1xf32>
    %cst_39 = arith.constant 3.200000e+01 : f32
    %143 = vector.broadcast %cst_39 : f32 to vector<16x1xf32>
    %144 = arith.divf %142, %143 : vector<16x1xf32>
    %145 = vector.broadcast %144 : vector<16x1xf32> to vector<16x32xf32>
    %146 = arith.subf %140, %145 : vector<16x32xf32>
    %147 = arith.mulf %146, %146 : vector<16x32xf32>
    %cst_40 = arith.constant dense<0.000000e+00> : vector<16xf32>
    %148 = vector.multi_reduction <add>, %147, %cst_40 [1] : vector<16x32xf32> to vector<16xf32>
    %149 = vector.shape_cast %148 : vector<16xf32> to vector<16x1xf32>
    %cst_41 = arith.constant 3.200000e+01 : f32
    %150 = vector.broadcast %cst_41 : f32 to vector<16x1xf32>
    %151 = arith.divf %149, %150 : vector<16x1xf32>
    %152 = vector.broadcast %144 : vector<16x1xf32> to vector<16x32xf32>
    %153 = arith.subf %140, %152 : vector<16x32xf32>
    %cst_42 = arith.constant 9.99999974E-6 : f32
    %154 = vector.broadcast %cst_42 : f32 to vector<16x1xf32>
    %155 = arith.addf %151, %154 : vector<16x1xf32>
    %156 = math.rsqrt %155 : vector<16x1xf32>
    %157 = vector.broadcast %156 : vector<16x1xf32> to vector<16x32xf32>
    %158 = arith.mulf %153, %157 : vector<16x32xf32>
    %159 = vector.broadcast %11 : vector<1x32xf32> to vector<16x32xf32>
    %160 = arith.mulf %158, %159 : vector<16x32xf32>
    %161 = vector.broadcast %12 : vector<1x32xf32> to vector<16x32xf32>
    %162 = arith.addf %160, %161 : vector<16x32xf32>
    %163 = arith.truncf %162 : vector<16x32xf32> to vector<16x32xbf16>
    %c0_43 = arith.constant 0 : index
    %c0_44 = arith.constant 0 : index
    %c0_45 = arith.constant 0 : index
    %164 = vector.load %arg6[%c0_43, %c0_44, %c0_45] : memref<1x32x128xbf16, #tpu.memory_space<vmem>>, vector<1x32x128xbf16>
    %165 = vector.shape_cast %164 : vector<1x32x128xbf16> to vector<32x128xbf16>
    %cst_46 = arith.constant dense<0.000000e+00> : vector<16x128xf32>
    %166 = tpu.matmul %163, %165, %cst_46 {dimension_numbers = #tpu.dot_dimension_numbers<[1], [0], [0], [1], [0, 0, 1, 1], [], []>} : vector<16x32xbf16>, vector<32x128xbf16>, vector<16x128xf32> -> vector<16x128xf32>
    %c0_47 = arith.constant 0 : index
    %c0_48 = arith.constant 0 : index
    %c0_49 = arith.constant 0 : index
    %167 = vector.load %arg9[%c0_47, %c0_48, %c0_49] : memref<1x1x128xf32, #tpu.memory_space<vmem>>, vector<1x1x128xf32>
    %168 = vector.shape_cast %167 : vector<1x1x128xf32> to vector<1x128xf32>
    %169 = vector.broadcast %168 : vector<1x128xf32> to vector<16x128xf32>
    %170 = arith.addf %166, %169 : vector<16x128xf32>
    %cst_50 = arith.constant 0.000000e+00 : f32
    %171 = vector.broadcast %cst_50 : f32 to vector<16x128xf32>
    %172 = arith.maximumf %170, %171 : vector<16x128xf32>
    %173 = arith.truncf %172 : vector<16x128xf32> to vector<16x128xbf16>
    %c0_51 = arith.constant 0 : index
    %c0_52 = arith.constant 0 : index
    %c0_53 = arith.constant 0 : index
    %174 = vector.load %arg7[%c0_51, %c0_52, %c0_53] : memref<1x128x32xbf16, #tpu.memory_space<vmem>>, vector<1x128x32xbf16>
    %175 = vector.shape_cast %174 : vector<1x128x32xbf16> to vector<128x32xbf16>
    %cst_54 = arith.constant dense<0.000000e+00> : vector<16x32xf32>
    %176 = tpu.matmul %173, %175, %cst_54 {dimension_numbers = #tpu.dot_dimension_numbers<[1], [0], [0], [1], [0, 0, 1, 1], [], []>} : vector<16x128xbf16>, vector<128x32xbf16>, vector<16x32xf32> -> vector<16x32xf32>
    %177 = vector.broadcast %10 : vector<1x32xf32> to vector<16x32xf32>
    %178 = arith.addf %176, %177 : vector<16x32xf32>
    %179 = arith.addf %162, %178 : vector<16x32xf32>
    %cst_55 = arith.constant dense<0.000000e+00> : vector<16xf32>
    %180 = vector.multi_reduction <add>, %179, %cst_55 [1] : vector<16x32xf32> to vector<16xf32>
    %181 = vector.shape_cast %180 : vector<16xf32> to vector<16x1xf32>
    %cst_56 = arith.constant 3.200000e+01 : f32
    %182 = vector.broadcast %cst_56 : f32 to vector<16x1xf32>
    %183 = arith.divf %181, %182 : vector<16x1xf32>
    %184 = vector.broadcast %183 : vector<16x1xf32> to vector<16x32xf32>
    %185 = arith.subf %179, %184 : vector<16x32xf32>
    %186 = arith.mulf %185, %185 : vector<16x32xf32>
    %cst_57 = arith.constant dense<0.000000e+00> : vector<16xf32>
    %187 = vector.multi_reduction <add>, %186, %cst_57 [1] : vector<16x32xf32> to vector<16xf32>
    %188 = vector.shape_cast %187 : vector<16xf32> to vector<16x1xf32>
    %cst_58 = arith.constant 3.200000e+01 : f32
    %189 = vector.broadcast %cst_58 : f32 to vector<16x1xf32>
    %190 = arith.divf %188, %189 : vector<16x1xf32>
    %191 = vector.broadcast %183 : vector<16x1xf32> to vector<16x32xf32>
    %192 = arith.subf %179, %191 : vector<16x32xf32>
    %cst_59 = arith.constant 9.99999974E-6 : f32
    %193 = vector.broadcast %cst_59 : f32 to vector<16x1xf32>
    %194 = arith.addf %190, %193 : vector<16x1xf32>
    %195 = math.rsqrt %194 : vector<16x1xf32>
    %196 = vector.broadcast %195 : vector<16x1xf32> to vector<16x32xf32>
    %197 = arith.mulf %192, %196 : vector<16x32xf32>
    %198 = vector.broadcast %13 : vector<1x32xf32> to vector<16x32xf32>
    %199 = arith.mulf %197, %198 : vector<16x32xf32>
    %200 = vector.broadcast %14 : vector<1x32xf32> to vector<16x32xf32>
    %201 = arith.addf %199, %200 : vector<16x32xf32>
    %c0_60 = arith.constant 0 : index
    %c0_61 = arith.constant 0 : index
    %202 = vector.load %arg11[%c0_60, %c0_61] : memref<16x32xf32, #tpu.memory_space<vmem>>, vector<16x32xf32>
    tpu.vector_store %arg11[%c0_60, %c0_61], %201 {strides = array<i32>} : memref<16x32xf32, #tpu.memory_space<vmem>>, vector<16x32xf32>,
    %203 = vector.shape_cast %201 : vector<16x32xf32> to vector<2x8x32xf32>
    %c0_62 = arith.constant 0 : index
    %c0_63 = arith.constant 0 : index
    %c0_64 = arith.constant 0 : index
    %c0_65 = arith.constant 0 : index
    %204 = vector.load %arg10[%c0_62, %c0_63, %c0_64, %c0_65] : memref<1x2x8x32xf32, #tpu.memory_space<vmem>>, vector<1x2x8x32xf32>
    %205 = vector.shape_cast %204 : vector<1x2x8x32xf32> to vector<2x8x32xf32>
    %206 = vector.shape_cast %203 : vector<2x8x32xf32> to vector<1x2x8x32xf32>
    tpu.vector_store %arg10[%c0_62, %c0_63, %c0_64, %c0_65], %206 {strides = array<i32>} : memref<1x2x8x32xf32, #tpu.memory_space<vmem>>, vector<1x2x8x32xf32>,
    return
  }
  func.func @transform_0(%arg0: i32, %arg1: i32) -> (i32, i32, i32) {
    %c0_i32 = arith.constant 0 : i32
    %c0_i32_0 = arith.constant 0 : i32
    %c0_i32_1 = arith.constant 0 : i32
    return %arg0, %c0_i32, %c0_i32_0 : i32, i32, i32
  }
  func.func @transform_1(%arg0: i32, %arg1: i32) -> (i32, i32, i32) {
    %c0_i32 = arith.constant 0 : i32
    %c0_i32_0 = arith.constant 0 : i32
    %c0_i32_1 = arith.constant 0 : i32
    return %arg0, %c0_i32, %c0_i32_0 : i32, i32, i32
  }
  func.func @transform_2(%arg0: i32, %arg1: i32) -> (i32, i32, i32) {
    %c0_i32 = arith.constant 0 : i32
    %c0_i32_0 = arith.constant 0 : i32
    %c0_i32_1 = arith.constant 0 : i32
    return %arg1, %c0_i32, %c0_i32_0 : i32, i32, i32
  }
  func.func @transform_3(%arg0: i32, %arg1: i32) -> (i32, i32, i32) {
    %c0_i32 = arith.constant 0 : i32
    %c0_i32_0 = arith.constant 0 : i32
    %c0_i32_1 = arith.constant 0 : i32
    return %arg1, %c0_i32, %c0_i32_0 : i32, i32, i32
  }
  func.func @transform_4(%arg0: i32, %arg1: i32) -> (i32, i32, i32) {
    %c0_i32 = arith.constant 0 : i32
    %c0_i32_0 = arith.constant 0 : i32
    %c0_i32_1 = arith.constant 0 : i32
    return %arg1, %c0_i32, %c0_i32_0 : i32, i32, i32
  }
  func.func @transform_5(%arg0: i32, %arg1: i32) -> (i32, i32, i32) {
    %c0_i32 = arith.constant 0 : i32
    %c0_i32_0 = arith.constant 0 : i32
    %c0_i32_1 = arith.constant 0 : i32
    return %arg1, %c0_i32, %c0_i32_0 : i32, i32, i32
  }
  func.func @transform_6(%arg0: i32, %arg1: i32) -> (i32, i32, i32) {
    %c0_i32 = arith.constant 0 : i32
    %c0_i32_0 = arith.constant 0 : i32
    %c0_i32_1 = arith.constant 0 : i32
    return %arg1, %c0_i32, %c0_i32_0 : i32, i32, i32
  }
  func.func @transform_7(%arg0: i32, %arg1: i32) -> (i32, i32, i32) {
    %c0_i32 = arith.constant 0 : i32
    %c0_i32_0 = arith.constant 0 : i32
    %c0_i32_1 = arith.constant 0 : i32
    return %arg1, %c0_i32, %c0_i32_0 : i32, i32, i32
  }
  func.func @transform_8(%arg0: i32, %arg1: i32) -> (i32, i32, i32, i32) {
    %c0_i32 = arith.constant 0 : i32
    %c0_i32_0 = arith.constant 0 : i32
    %c0_i32_1 = arith.constant 0 : i32
    return %arg1, %arg0, %c0_i32, %c0_i32_0 : i32, i32, i32, i32
  }
}

</mosaic_0001>

<bundles_post_ra>
// kernel: transformer_encoder_forward.1
= control target key start
LH: loop header
LB: loop body
LE: loop exit
PB: predicated region body
PF: predicated region fallthrough
CT: control target
= control target key end

     0   :  { %s2439_s27 = smov 0   ;;  %s2441_s28 = smov 0   ;;  %s2756_s0 = inlined_call_operand.vmem [shape: f32[2,8,32], index: 0, kind: input, shape index: {}]   ;;  %s2757_s1 = inlined_call_operand.vmem [shape: f32[2,1,8], index: 1, kind: input, shape index: {}]   ;;  %s2758_s2 = inlined_call_operand.vmem [shape: bf16[2,32,96], index: 2, kind: input, shape index: {}]   ;;  %s2759_s3 = inlined_call_operand.vmem [shape: bf16[2,32,32], index: 3, kind: input, shape index: {}]   ;;  %s2760_s4 = inlined_call_operand.vmem [shape: bf16[2,32,128], index: 4, kind: input, shape index: {}]   ;;  %s2761_s5 = inlined_call_operand.vmem [shape: bf16[2,128,32], index: 5, kind: input, shape index: {}]   ;;  %s2762_s6 = inlined_call_operand.vmem [shape: f32[2,9,32], index: 6, kind: input, shape index: {}]   ;;  %s2763_s7 = inlined_call_operand.vmem [shape: f32[2,1,128], index: 7, kind: input, shape index: {}]   ;;  %s2764_s8 = inlined_call_operand.vmem [shape: f32[2,2,8,32], index: 8, kind: output, shape index: {}]  }
   0x1   :  { %2765 = sst [smem:[#allocation4_spill]] %s2758_s2  ;;  %s2443_s29 = smov 0  }
   0x2 LB: > { %s27_s30 = sadd.s32 1, %s2371_s28  ;;  %p2008_p0 = scmp.ge.s32.totalorder %s2375_s29, 1  ;;  %s2375_s29 = sphi %s2443_s29, %s18_s29   ;;  %s2371_s28 = sphi %s2441_s28, %s2768_s28   ;;  %s2367_s27 = sphi %s2439_s27, %s2767_s27  }
   0x3   : > { %p28_p1 = scmp.ge.s32.totalorder %s27_s30, 2  ;;  %p345_p2 = scmp.lt.s32.totalorder %s2375_s29, 3 }
   0x5   : > { %s2770_s30 = smov (%p28_p1, %s27_s30), 0  ;;  %p346_p3 = pnand %p2008_p0, %p345_p2 }
   0x6   : > { %p426_p4 = scmp.lt.s32.totalorder (!%p346_p3), %s2367_s27, 1  ;;  %s2766_s2 = sld [smem:[#allocation4_spill]] (!%p346_p3) }
   0x7   : > { %349 = sbr.rel (%p346_p3) target bundleno = 4178 (0x1052), region = 52  ;;  %p2021_p5 = scmp.ne.s32.totalorder (!%p346_p3), %s2367_s27, 0 }
   0xe   : > { %s2457_s9 = scalar_select %p426_p4, %s2367_s27, 1 }
   0xf   : > { %468 = sbr.rel (%p2021_p5) target bundleno = 22 (0x16), region = 56  ;;  %v469_v0 = vld [vmem:[%s2756_s0] sm:$0xff] (!%p2021_p5)  ;;  %vm471_vm0 = vcmask (!%p2021_p5), 261120   ;;  %v470_v1 = vld [vmem:[%s2756_s0 + $0x8] sm:$0xff] (!%p2021_p5) }
  0x10   : > { %s2061_s10 = sshll.u32 %s2457_s9, 4  ;;  %s2064_s11 = sshll.u32 %s2457_s9, 6  ;;  %472 = vst.msk [vmem:[#allocation2] sm:$0xff] (!%p2021_p5), %vm471_vm0, %v469_v0  ;;  %473 = vst.msk [vmem:[#allocation2 + $0x8] sm:$0xff] (!%p2021_p5), %vm471_vm0, %v470_v1 }
  0x11   : > { %s430_s14 = scalar_lea.vmem %s2766_s2, %s2061_s10  ;;  %s2467_s17 = scalar_lea.vmem %s2759_s3, %s2061_s10 }
  0x12   : > { %s2472_s20 = scalar_lea.vmem %s2760_s4, %s2061_s10  ;;  %s2477_s23 = scalar_lea.vmem %s2761_s5, %s2064_s11 }
  0x13   : > { %s2482_s26 = scalar_lea.vmem %s2762_s6, %s2061_s10  ;;  %s453_s15 = scalar_lea.vmem %s2763_s7, %s2457_s9 }
  0x14   : > { %s2491_s18 = scalar_lea.vmem %s2764_s8, %s2061_s10 }
  0x16 PF: > { %v2298_v2 = vld [vmem:[%s430_s14] sm:$0xff]   ;;  %v540_v3 = vlaneseq  ;;  %v2377_v4 = vmov 0.0   ;;  %v2299_v5 = vld [vmem:[%s430_s14 + $0x8] sm:$0xff]   ;;  %vm2378_vm1 = vmmov 0   ;;  %vm495_vm2 = vcmask 261120   ;;  %s2379_s2 = smov 32  }
  0x17   : > { %2117 = vmatprep.subr.bf16.mxu0 %v2377_v4  ;;  %2137 = vmatprep.subr.bf16.mxu1 %v2377_v4  ;;  %v2503_v6 = vld [vmem:[#allocation2] sm:$0xff]  ;;  %v2505_v7 = vld [vmem:[#allocation2 + $0x8] sm:$0xff]  ;;  %s2380_s27 = smov 96   ;;  %vm589_vm3 = vcmask 64512   ;;  %s2381_s12 = smov 64   ;;  %vm715_vm4 = vcmask 1043456  }
  0x18   : > { %2118 = vmatpush3.bf16.msra.mxu0 %v2298_v2  ;;  %2121 = vmatprep.mubr.msk.bf16.mxu0 %vm2378_vm1, %v2377_v4  ;;  %v2508_v8 = vld [vmem:[%s2482_s26] sm:$0xff]  ;;  %v2510_v9 = vshrl.u32 %v540_v3, 7  ;;  %v478_v11 = vpack.c.bf16 %v2505_v7, %v2503_v6  ;;  %s2382_s13 = smov 88   ;;  %s2383_s16 = smov 120   ;;  %vm1040_vm5 = vcmask 130112   ;;  %vm1271_vm6 = vcmask 195712  }
  0x19   : > { %2119 = vmatprep.subr.bf16.mxu0 %v2377_v4  ;;  %2139 = vmatprep.mubr.msk.bf16.mxu1 %vm2378_vm1, %v2377_v4  ;;  %v2550_v32 = vld [vmem:[%s2757_s1] ss:$0 sm:$0xff]  ;;  %v2557_v39 = vld [vmem:[%s2757_s1 + $0x1] ss:$0 sm:$0xff]  ;;  %s2384_s19 = smov 56   ;;  %s2385_s21 = smov 80  }
  0x1a   : > { %v548_v10 = vsub.s32 1, %v2510_v9  ;;  %v542_v22 = vsub.s32 0, %v2510_v9  ;;  %v558_v46 = vsub.s32 2, %v2510_v9  ;;  %s2386_s11 = smov 112   ;;  %s2387_s22 = smov 48   ;;  %vm1502_vm7 = vcmask 261312  }
  0x1b   : > { %s2390_s10 = smov 40   ;;  %s2391_s14 = smov 8  }
  0x1c   : > { %2120 = vmatpush3.bf16.msra.mxu0 %v2299_v5  ;;  %v549_v12 = vrot.slane %v2508_v8, %v548_v10  ;;  %v543_v23 = vrot.slane %v2508_v8, %v542_v22  ;;  %v559_v47 = vrot.slane %v2508_v8, %v558_v46  ;;  %s2392_s24 = smov 16   ;;  %s2393_s25 = smov 24  }
  0x1d   : > { %2125 = vmatprep.subr.bf16.mxu0 %v2377_v4 }
  0x1e   : > { %551 = vrot.lane.b32.xlu0 %v549_v12, %s2379_s2  ;;  %s2388_s2 = smov 72  }
  0x1f   : > { %2122 = vmatmul.mubr.msk.bf16.vlgmr.msra.gmra.mrb[0].mxu0 %vm495_vm2, %v478_v11 }
  0x20   : > { %2127 = vmatprep.mubr.msk.bf16.mxu0 %vm2378_vm1, %v2377_v4 }
  0x90   : > { %v552_v13 = vpop.permute.xlu0 %551 }
  0xf2   : > { %v533_v14 = vpop.f32.mrb[0].mxu0 }
  0xf3   : > { %v554_v15 = vadd.f32 %v552_v13, %v533_v14  ;;  %v2123_v16 = vpop.f32.mrb[1].mxu0  ;;  %v544_v26 = vadd.f32 %v543_v23, %v533_v14 }
  0xf4   : > { %v536_v17 = vpop.f32.mrb[2].mxu0 }
  0xf5   : > { %v2523_v18 = vpack.c.bf16 %v554_v15, %v554_v15  ;;  %v555_v19 = vadd.f32 %v552_v13, %v536_v17  ;;  %v2124_v20 = vpop.f32.mrb[3].mxu0  ;;  %v2533_v28 = vpack.c.bf16 %v544_v26, %v544_v26  ;;  %v545_v30 = vadd.f32 %v543_v23, %v536_v17 }
  0xf7   : > { %v2525_v21 = vpack.c.bf16 %v555_v19, %v555_v19  ;;  %587 = vrot.lane.b32.xlu0 %v2523_v18, %s2380_s27  ;;  %v2541_v31 = vpack.c.bf16 %v545_v30, %v545_v30 }
  0xf9   : > { %637 = vrot.lane.b32.xlu1 %v2525_v21, %s2380_s27  ;;  %s2389_s27 = smov 104  }
 0x169   : > { %v588_v24 = vpop.permute.xlu0 %587 }
 0x16a   : > { %v594_v25 = vsel %vm589_vm3, %v588_v24, 0 }
 0x16b   : > { %2126 = vmatpush3.bf16.xpose.msra.mxu0 %v594_v25  ;;  %v638_v27 = vpop.permute.xlu1 %637 }
 0x16c   : > { %2131 = vmatprep.subr.bf16.mxu0 %v2377_v4  ;;  %v643_v29 = vsel %vm589_vm3, %v638_v27, 0 }
 0x172   : > { %2128 = vmatmul.mubr.msk.bf16.vlgmr.msra.gmra.mrb[4].mxu0 %vm589_vm3, %v2533_v28 }
 0x173   : > { %2132 = vmatpush3.bf16.xpose.msra.mxu0 %v643_v29  ;;  %2133 = vmatprep.mubr.msk.bf16.mxu0 %vm2378_vm1, %v2377_v4 }
 0x174   : > { %2143 = vmatprep.subr.bf16.mxu0 %v2377_v4 }
 0x17a   : > { %2134 = vmatmul.mubr.msk.bf16.vlgmr.msra.gmra.mrb[8].mxu0 %vm589_vm3, %v2541_v31 }
 0x17b   : > { %2145 = vmatprep.mubr.msk.bf16.mxu0 %vm2378_vm1, %v2377_v4 }
 0x245   : > { %v630_v33 = vpop.f32.mrb[4].mxu0 }
 0x246   : > { %v631_v34 = vadd.f32 %v2550_v32, %v630_v33  ;;  %v2129_v35 = vpop.f32.mrb[5].mxu0 }
 0x247   : > { %v633_v36 = vpop.f32.mrb[6].mxu0 }
 0x248   : > { %v2130_v37 = vpop.f32.mrb[7].mxu0  ;;  %v685_v38 = vsel %vm589_vm3, %v631_v34, -inf }
 0x249   : > { %686 = vmax.xlane.f32.xlu1 %v685_v38 }
 0x24d   : > { %v679_v40 = vpop.f32.mrb[8].mxu0 }
 0x24e   : > { %v680_v41 = vadd.f32 %v2557_v39, %v679_v40  ;;  %v2135_v42 = vpop.f32.mrb[9].mxu0 }
 0x24f   : > { %v682_v43 = vpop.f32.mrb[10].mxu0 }
 0x250   : > { %v2136_v44 = vpop.f32.mrb[11].mxu0  ;;  %v688_v45 = vsel %vm589_vm3, %v680_v41, -inf }
 0x251   : > { %689 = vmax.xlane.f32.xlu0 %v688_v45 }
 0x267   : > { %561 = vrot.lane.b32.xlu0 %v559_v47, %s2381_s12 }
 0x2d6   : > { %v687_v54 = vpop.xlane.xlu1 %686 }
 0x2d7   : > { %v691_v55 = vsub.f32 %v631_v34, %v687_v54 }
 0x2d9   : > { %v693_v56 = vmul.f32 1.442695, %v691_v55 }
 0x2db   : > { %2312 = vpow2.f32 %v693_v56 }
 0x2de   : > { %v690_v48 = vpop.xlane.xlu0 %689 }
 0x2df   : > { %v692_v57 = vsub.f32 %v680_v41, %v690_v48 }
 0x2e1   : > { %v695_v58 = vmul.f32 1.442695, %v692_v57 }
 0x2e2   : > { %v562_v49 = vpop.permute.xlu0 %561 }
 0x2e3   : > { %v564_v50 = vadd.f32 %v562_v49, %v533_v14  ;;  %v565_v51 = vadd.f32 %v562_v49, %v536_v17  ;;  %2314 = vpow2.f32 %v695_v58 }
 0x2e5   : > { %v2563_v52 = vpack.c.bf16 %v564_v50, %v564_v50  ;;  %v2565_v53 = vpack.c.bf16 %v565_v51, %v565_v51  ;;  %v2313_v59 = vpop.eup %2312 }
 0x2e6   : > { %v697_v60 = vsel %vm589_vm3, %v2313_v59, 0.0 }
 0x2e7   : > { %760 = vrot.lane.b32.xlu0 %v2565_v53, %s2381_s12  ;;  %710 = vrot.lane.b32.xlu1 %v2563_v52, %s2381_s12 }
 0x2eb   : > { %813 = vrot.lane.b32.xlu0 %v2523_v18, %s2382_s13 }
 0x2ed   : > { %v2315_v61 = vpop.eup %2314 }
 0x2ee   : > { %v700_v62 = vsel %vm589_vm3, %v2315_v61, 0.0 }
 0x2ef   : > { %811 = vrot.lane.b32.xlu0 %v2533_v28, %s2383_s16 }
 0x30b   : > { %698 = vadd.xlane.f32.xlu1 %v697_v60 }
 0x30f   : > { %701 = vadd.xlane.f32.xlu1 %v700_v62 }
 0x320   : > { %864 = vrot.lane.b32.xlu1 %v2525_v21, %s2382_s13 }
 0x324   : > { %862 = vrot.lane.b32.xlu1 %v2541_v31, %s2383_s16 }
 0x359   : > { %v761_v63 = vpop.permute.xlu0 %760  ;;  %v711_v0 = vpop.permute.xlu1 %710 }
 0x35a   : > { %v766_v1 = vsel %vm715_vm4, %v761_v63, 0  ;;  %v717_v2 = vsel %vm715_vm4, %v711_v0, 0 }
 0x35b   : > { %2138 = vmatpush3.bf16.msra.mxu1 %v717_v2  ;;  %2144 = vmatpush3.bf16.msra.mxu0 %v766_v1 }
 0x35c   : > { %2149 = vmatprep.subr.bf16.mxu1 %v2377_v4  ;;  %2155 = vmatprep.subr.bf16.mxu0 %v2377_v4 }
 0x35d   : > { %v814_v12 = vpop.permute.xlu0 %813 }
 0x35e   : > { %v819_v15 = vsel %vm589_vm3, %v814_v12, 0 }
 0x361   : > { %v812_v22 = vpop.permute.xlu0 %811 }
 0x398   : > { %v699_v3 = vpop.xlane.xlu1 %698 }
 0x399   : > { %2316 = vrcp.f32 %v699_v3 }
 0x39c   : > { %v702_v5 = vpop.xlane.xlu1 %701 }
 0x39d   : > { %2318 = vrcp.f32 %v702_v5 }
 0x3a0   : > { %v865_v17 = vpop.permute.xlu1 %864 }
 0x3a1   : > { %v870_v20 = vsel %vm589_vm3, %v865_v17, 0 }
 0x3a3   : > { %v2317_v10 = vpop.eup %2316 }
 0x3a4   : > { %v705_v11 = vmul.f32 %v2317_v10, %v2313_v59  ;;  %v863_v23 = vpop.permute.xlu1 %862 }
 0x3a6   : > { %v707_v13 = vpack.c.bf16 %v705_v11, %v705_v11 }
 0x3a7   : > { %v2319_v14 = vpop.eup %2318 }
 0x3a8   : > { %v706_v16 = vmul.f32 %v2319_v14, %v2315_v61  ;;  %2140 = vmatmul.mubr.msk.bf16.vlgmr.msra.gmra.mrb[0].mxu1 %vm589_vm3, %v707_v13 }
 0x3a9   : > { %2150 = vmatpush3.bf16.xpose.msra.mxu1 %v819_v15  ;;  %2151 = vmatprep.mubr.msk.bf16.mxu1 %vm2378_vm1, %v2377_v4 }
 0x3aa   : > { %v708_v19 = vpack.c.bf16 %v706_v16, %v706_v16  ;;  %2161 = vmatprep.subr.bf16.mxu1 %v2377_v4 }
 0x3ac   : > { %2146 = vmatmul.mubr.msk.bf16.vlgmr.msra.gmra.mrb[12].mxu0 %vm589_vm3, %v708_v19 }
 0x3ad   : > { %2156 = vmatpush3.bf16.xpose.msra.mxu0 %v870_v20  ;;  %2157 = vmatprep.mubr.msk.bf16.mxu0 %vm2378_vm1, %v2377_v4 }
 0x3ae   : > { %2167 = vmatprep.subr.bf16.mxu0 %v2377_v4 }
 0x3b0   : > { %2152 = vmatmul.mubr.msk.bf16.vlgmr.msra.gmra.mrb[4].mxu1 %vm589_vm3, %v812_v22 }
 0x3b1   : > { %2163 = vmatprep.mubr.msk.bf16.mxu1 %vm2378_vm1, %v2377_v4 }
 0x3b4   : > { %2158 = vmatmul.mubr.msk.bf16.vlgmr.msra.gmra.mrb[16].mxu0 %vm589_vm3, %v863_v23 }
 0x3b5   : > { %2169 = vmatprep.mubr.msk.bf16.mxu0 %vm2378_vm1, %v2377_v4 }
 0x47b   : > { %v753_v24 = vpop.f32.mrb[0].mxu1 }
 0x47c   : > { %808 = vst.msk [vmem:[#allocation3] sm:$0xff] %vm589_vm3, %v753_v24  ;;  %v2141_v25 = vpop.f32.mrb[1].mxu1 }
 0x47d   : > { %v756_v26 = vpop.f32.mrb[2].mxu1 }
 0x47e   : > { %v2142_v27 = vpop.f32.mrb[3].mxu1 }
 0x47f   : > { %v802_v29 = vpop.f32.mrb[12].mxu0 }
 0x480   : > { %809 = vst.msk [vmem:[#allocation3 + $0x8] sm:$0xff] %vm589_vm3, %v802_v29  ;;  %v2147_v30 = vpop.f32.mrb[13].mxu0 }
 0x481   : > { %v805_v33 = vpop.f32.mrb[14].mxu0 }
 0x482   : > { %v2148_v34 = vpop.f32.mrb[15].mxu0 }
 0x483   : > { %v855_v35 = vpop.f32.mrb[4].mxu1 }
 0x484   : > { %v856_v36 = vadd.f32 %v2550_v32, %v855_v35  ;;  %v2153_v37 = vpop.f32.mrb[5].mxu1 }
 0x485   : > { %v858_v38 = vpop.f32.mrb[6].mxu1 }
 0x486   : > { %v2154_v40 = vpop.f32.mrb[7].mxu1  ;;  %v912_v41 = vsel %vm589_vm3, %v856_v36, -inf }
 0x487   : > { %913 = vmax.xlane.f32.xlu0 %v912_v41  ;;  %v906_v42 = vpop.f32.mrb[16].mxu0 }
 0x488   : > { %v907_v43 = vadd.f32 %v2557_v39, %v906_v42  ;;  %v2159_v44 = vpop.f32.mrb[17].mxu0 }
 0x489   : > { %v909_v45 = vpop.f32.mrb[18].mxu0 }
 0x48a   : > { %v2160_v46 = vpop.f32.mrb[19].mxu0  ;;  %v915_v47 = vsel %vm589_vm3, %v907_v43, -inf }
 0x48b   : > { %916 = vmax.xlane.f32.xlu1 %v915_v47 }
 0x49c   : > { %936 = vrot.lane.b32.xlu1 %v2563_v52, %s2384_s19 }
 0x4a0   : > { %1045 = vrot.lane.b32.xlu1 %v2523_v18, %s2385_s21 }
 0x4a4   : > { %1095 = vrot.lane.b32.xlu1 %v2525_v21, %s2385_s21 }
 0x4a8   : > { %1093 = vrot.lane.b32.xlu1 %v2541_v31, %s2386_s11 }
 0x514   : > { %v914_v48 = vpop.xlane.xlu0 %913 }
 0x515   : > { %v918_v49 = vsub.f32 %v856_v36, %v914_v48 }
 0x517   : > { %v920_v50 = vmul.f32 1.442695, %v918_v49 }
 0x518   : > { %v917_v51 = vpop.xlane.xlu1 %916 }
 0x519   : > { %2320 = vpow2.f32 %v920_v50  ;;  %v919_v54 = vsub.f32 %v907_v43, %v917_v51 }
 0x51b   : > { %v922_v55 = vmul.f32 1.442695, %v919_v54 }
 0x51c   : > { %v937_v56 = vpop.permute.xlu1 %936 }
 0x51d   : > { %2322 = vpow2.f32 %v922_v55  ;;  %v942_v57 = vsel %vm715_vm4, %v937_v56, 0 }
 0x51e   : > { %2162 = vmatpush3.bf16.msra.mxu1 %v942_v57 }
 0x51f   : > { %2173 = vmatprep.subr.bf16.mxu1 %v2377_v4 }
 0x520   : > { %v1046_v3 = vpop.permute.xlu1 %1045 }
 0x521   : > { %v1051_v12 = vsel %vm589_vm3, %v1046_v3, 0 }
 0x523   : > { %v2321_v58 = vpop.eup %2320 }
 0x524   : > { %v924_v59 = vsel %vm589_vm3, %v2321_v58, 0.0  ;;  %v1096_v14 = vpop.permute.xlu1 %1095 }
 0x525   : > { %925 = vadd.xlane.f32.xlu0 %v924_v59  ;;  %v1101_v16 = vsel %vm589_vm3, %v1096_v14, 0 }
 0x527   : > { %v2323_v60 = vpop.eup %2322 }
 0x528   : > { %v927_v61 = vsel %vm589_vm3, %v2323_v60, 0.0  ;;  %v1094_v19 = vpop.permute.xlu1 %1093 }
 0x529   : > { %928 = vadd.xlane.f32.xlu0 %v927_v61 }
 0x53f   : > { %984 = vrot.lane.b32.xlu0 %v2565_v53, %s2384_s19 }
 0x543   : > { %1043 = vrot.lane.b32.xlu0 %v2533_v28, %s2386_s11 }
 0x5b2   : > { %v926_v62 = vpop.xlane.xlu0 %925 }
 0x5b3   : > { %2324 = vrcp.f32 %v926_v62 }
 0x5b6   : > { %v929_v63 = vpop.xlane.xlu0 %928 }
 0x5b7   : > { %2326 = vrcp.f32 %v929_v63 }
 0x5ba   : > { %v985_v0 = vpop.permute.xlu0 %984 }
 0x5bb   : > { %v990_v1 = vsel %vm715_vm4, %v985_v0, 0 }
 0x5bc   : > { %2168 = vmatpush3.bf16.msra.mxu0 %v990_v1 }
 0x5bd   : > { %v2325_v2 = vpop.eup %2324  ;;  %2179 = vmatprep.subr.bf16.mxu0 %v2377_v4 }
 0x5be   : > { %v932_v5 = vmul.f32 %v2325_v2, %v2321_v58  ;;  %v1044_v17 = vpop.permute.xlu0 %1043 }
 0x5c0   : > { %v934_v10 = vpack.c.bf16 %v932_v5, %v932_v5 }
 0x5c1   : > { %v2327_v11 = vpop.eup %2326 }
 0x5c2   : > { %v933_v13 = vmul.f32 %v2327_v11, %v2323_v60  ;;  %2164 = vmatmul.mubr.msk.bf16.vlgmr.msra.gmra.mrb[8].mxu1 %vm589_vm3, %v934_v10 }
 0x5c3   : > { %2174 = vmatpush3.bf16.xpose.msra.mxu1 %v1051_v12  ;;  %2175 = vmatprep.mubr.msk.bf16.mxu1 %vm2378_vm1, %v2377_v4 }
 0x5c4   : > { %v935_v15 = vpack.c.bf16 %v933_v13, %v933_v13  ;;  %2185 = vmatprep.subr.bf16.mxu1 %v2377_v4 }
 0x5c6   : > { %2170 = vmatmul.mubr.msk.bf16.vlgmr.msra.gmra.mrb[20].mxu0 %vm589_vm3, %v935_v15 }
 0x5c7   : > { %2180 = vmatpush3.bf16.xpose.msra.mxu0 %v1101_v16  ;;  %2181 = vmatprep.mubr.msk.bf16.mxu0 %vm2378_vm1, %v2377_v4 }
 0x5c8   : > { %2191 = vmatprep.subr.bf16.mxu0 %v2377_v4 }
 0x5ca   : > { %2176 = vmatmul.mubr.msk.bf16.vlgmr.msra.gmra.mrb[12].mxu1 %vm589_vm3, %v1044_v17 }
 0x5cb   : > { %2187 = vmatprep.mubr.msk.bf16.mxu1 %vm2378_vm1, %v2377_v4 }
 0x5ce   : > { %2182 = vmatmul.mubr.msk.bf16.vlgmr.msra.gmra.mrb[24].mxu0 %vm589_vm3, %v1094_v19 }
 0x5cf   : > { %2193 = vmatprep.mubr.msk.bf16.mxu0 %vm2378_vm1, %v2377_v4 }
 0x695   : > { %v2629_v20 = vpop.f32.mrb[8].mxu1 }
 0x696   : > { %v2165_v22 = vpop.f32.mrb[9].mxu1 }
 0x697   : > { %v981_v23 = vpop.f32.mrb[10].mxu1 }
 0x698   : > { %v2166_v24 = vpop.f32.mrb[11].mxu1 }
 0x699   : > { %v2631_v25 = vpop.f32.mrb[20].mxu0 }
 0x69a   : > { %v2171_v26 = vpop.f32.mrb[21].mxu0 }
 0x69b   : > { %v1029_v27 = vpop.f32.mrb[22].mxu0 }
 0x69c   : > { %v2172_v29 = vpop.f32.mrb[23].mxu0 }
 0x69d   : > { %v1087_v30 = vpop.f32.mrb[12].mxu1 }
 0x69e   : > { %v1088_v33 = vadd.f32 %v2550_v32, %v1087_v30  ;;  %v2177_v34 = vpop.f32.mrb[13].mxu1 }
 0x69f   : > { %v1090_v35 = vpop.f32.mrb[14].mxu1 }
 0x6a0   : > { %v2178_v36 = vpop.f32.mrb[15].mxu1  ;;  %v1143_v37 = vsel %vm589_vm3, %v1088_v33, -inf }
 0x6a1   : > { %1144 = vmax.xlane.f32.xlu0 %v1143_v37  ;;  %v1137_v38 = vpop.f32.mrb[24].mxu0 }
 0x6a2   : > { %v1138_v40 = vadd.f32 %v2557_v39, %v1137_v38  ;;  %v2183_v41 = vpop.f32.mrb[25].mxu0 }
 0x6a3   : > { %v1140_v42 = vpop.f32.mrb[26].mxu0 }
 0x6a4   : > { %v2184_v43 = vpop.f32.mrb[27].mxu0  ;;  %v1146_v44 = vsel %vm589_vm3, %v1138_v40, -inf }
 0x6a5   : > { %1147 = vmax.xlane.f32.xlu1 %v1146_v44 }
 0x6b6   : > { %1167 = vrot.lane.b32.xlu1 %v2563_v52, %s2387_s22 }
 0x6ba   : > { %1276 = vrot.lane.b32.xlu1 %v2523_v18, %s2388_s2 }
 0x6be   : > { %1326 = vrot.lane.b32.xlu1 %v2525_v21, %s2388_s2 }
 0x6c2   : > { %1324 = vrot.lane.b32.xlu1 %v2541_v31, %s2389_s27 }
 0x72e   : > { %v1145_v45 = vpop.xlane.xlu0 %1144 }
 0x72f   : > { %v1149_v46 = vsub.f32 %v1088_v33, %v1145_v45 }
 0x731   : > { %v1151_v47 = vmul.f32 1.442695, %v1149_v46 }
 0x732   : > { %v1148_v48 = vpop.xlane.xlu1 %1147 }
 0x733   : > { %2328 = vpow2.f32 %v1151_v47  ;;  %v1150_v49 = vsub.f32 %v1138_v40, %v1148_v48 }
 0x735   : > { %v1153_v50 = vmul.f32 1.442695, %v1150_v49 }
 0x736   : > { %v1168_v51 = vpop.permute.xlu1 %1167 }
 0x737   : > { %2330 = vpow2.f32 %v1153_v50  ;;  %v1173_v54 = vsel %vm715_vm4, %v1168_v51, 0 }
 0x738   : > { %2186 = vmatpush3.bf16.msra.mxu1 %v1173_v54 }
 0x739   : > { %2197 = vmatprep.subr.bf16.mxu1 %v2377_v4 }
 0x73a   : > { %v1277_v61 = vpop.permute.xlu1 %1276 }
 0x73b   : > { %v1282_v1 = vsel %vm589_vm3, %v1277_v61, 0 }
 0x73d   : > { %v2329_v18 = vpop.eup %2328 }
 0x73e   : > { %v1155_v21 = vsel %vm589_vm3, %v2329_v18, 0.0 }
 0x73f   : > { %1156 = vadd.xlane.f32.xlu0 %v1155_v21 }
 0x741   : > { %v2331_v55 = vpop.eup %2330 }
 0x742   : > { %v1158_v31 = vsel %vm589_vm3, %v2331_v55, 0.0 }
 0x743   : > { %1159 = vadd.xlane.f32.xlu0 %v1158_v31 }
 0x759   : > { %1215 = vrot.lane.b32.xlu0 %v2565_v53, %s2387_s22 }
 0x75d   : > { %1274 = vrot.lane.b32.xlu0 %v2533_v28, %s2389_s27  ;;  %v1327_v28 = vpop.permute.xlu1 %1326 }
 0x75e   : > { %v1332_v5 = vsel %vm589_vm3, %v1327_v28, 0 }
 0x761   : > { %v1325_v11 = vpop.permute.xlu1 %1324 }
 0x7cc   : > { %v1157_v56 = vpop.xlane.xlu0 %1156 }
 0x7cd   : > { %2332 = vrcp.f32 %v1157_v56 }
 0x7d0   : > { %v1160_v57 = vpop.xlane.xlu0 %1159 }
 0x7d1   : > { %2334 = vrcp.f32 %v1160_v57 }
 0x7d4   : > { %v1216_v58 = vpop.permute.xlu0 %1215 }
 0x7d5   : > { %v1221_v59 = vsel %vm715_vm4, %v1216_v58, 0 }
 0x7d6   : > { %2192 = vmatpush3.bf16.msra.mxu0 %v1221_v59  ;;  %v2300_v59 = vld [vmem:[%s2467_s17] sm:$0xff]  }
 0x7d7   : > { %v2333_v60 = vpop.eup %2332  ;;  %2203 = vmatprep.subr.bf16.mxu0 %v2377_v4 }
 0x7d8   : > { %v1163_v62 = vmul.f32 %v2333_v60, %v2329_v18  ;;  %v1275_v10 = vpop.permute.xlu0 %1274  ;;  %v2301_v60 = vld [vmem:[%s2467_s17 + $0x8] sm:$0xff]  }
 0x7da   : > { %v1165_v63 = vpack.c.bf16 %v1163_v62, %v1163_v62 }
 0x7db   : > { %v2335_v0 = vpop.eup %2334 }
 0x7dc   : > { %v1164_v2 = vmul.f32 %v2335_v0, %v2331_v55  ;;  %2188 = vmatmul.mubr.msk.bf16.vlgmr.msra.gmra.mrb[16].mxu1 %vm589_vm3, %v1165_v63 }
 0x7dd   : > { %2198 = vmatpush3.bf16.xpose.msra.mxu1 %v1282_v1  ;;  %2199 = vmatprep.mubr.msk.bf16.mxu1 %vm2378_vm1, %v2377_v4 }
 0x7de   : > { %v1166_v3 = vpack.c.bf16 %v1164_v2, %v1164_v2  ;;  %2209 = vmatprep.subr.bf16.mxu1 %v2377_v4 }
 0x7e0   : > { %2194 = vmatmul.mubr.msk.bf16.vlgmr.msra.gmra.mrb[28].mxu0 %vm589_vm3, %v1166_v3 }
 0x7e1   : > { %2204 = vmatpush3.bf16.xpose.msra.mxu0 %v1332_v5  ;;  %2205 = vmatprep.mubr.msk.bf16.mxu0 %vm2378_vm1, %v2377_v4 }
 0x7e2   : > { %2215 = vmatprep.subr.bf16.mxu0 %v2377_v4 }
 0x7e4   : > { %2200 = vmatmul.mubr.msk.bf16.vlgmr.msra.gmra.mrb[20].mxu1 %vm589_vm3, %v1275_v10 }
 0x7e5   : > { %2211 = vmatprep.mubr.msk.bf16.mxu1 %vm2378_vm1, %v2377_v4 }
 0x7e8   : > { %2206 = vmatmul.mubr.msk.bf16.vlgmr.msra.gmra.mrb[32].mxu0 %vm589_vm3, %v1325_v11 }
 0x7e9   : > { %2217 = vmatprep.mubr.msk.bf16.mxu0 %vm2378_vm1, %v2377_v4 }
 0x8af   : > { %v1209_v12 = vpop.f32.mrb[16].mxu1 }
 0x8b0   : > { %v2189_v13 = vpop.f32.mrb[17].mxu1 }
 0x8b1   : > { %v1212_v14 = vpop.f32.mrb[18].mxu1 }
 0x8b2   : > { %v2190_v15 = vpop.f32.mrb[19].mxu1  ;;  %v1514_v14 = vsub.s32 3, %v2510_v9 }
 0x8b3   : > { %v1257_v16 = vpop.f32.mrb[28].mxu0 }
 0x8b4   : > { %v2195_v17 = vpop.f32.mrb[29].mxu0  ;;  %v1515_v15 = vrot.slane %v2508_v8, %v1514_v14  ;;  %v1702_v14 = vsub.s32 4, %v2510_v9 }
 0x8b5   : > { %v1260_v19 = vpop.f32.mrb[30].mxu0 }
 0x8b6   : > { %v2196_v22 = vpop.f32.mrb[31].mxu0 }
 0x8b7   : > { %v1318_v23 = vpop.f32.mrb[20].mxu1 }
 0x8b8   : > { %v1319_v24 = vadd.f32 %v2550_v32, %v1318_v23  ;;  %v2201_v26 = vpop.f32.mrb[21].mxu1 }
 0x8b9   : > { %v1321_v27 = vpop.f32.mrb[22].mxu1 }
 0x8ba   : > { %v2202_v29 = vpop.f32.mrb[23].mxu1  ;;  %v1374_v30 = vsel %vm589_vm3, %v1319_v24, -inf }
 0x8bb   : > { %1375 = vmax.xlane.f32.xlu0 %v1374_v30  ;;  %v1368_v33 = vpop.f32.mrb[32].mxu0 }
 0x8bc   : > { %v1369_v34 = vadd.f32 %v2557_v39, %v1368_v33  ;;  %v2207_v35 = vpop.f32.mrb[33].mxu0 }
 0x8bd   : > { %v1371_v36 = vpop.f32.mrb[34].mxu0 }
 0x8be   : > { %v2208_v37 = vpop.f32.mrb[35].mxu0  ;;  %v1377_v38 = vsel %vm589_vm3, %v1369_v34, -inf }
 0x8bf   : > { %1378 = vmax.xlane.f32.xlu1 %v1377_v38 }
 0x8d0   : > { %1398 = vrot.lane.b32.xlu1 %v2563_v52, %s2390_s10 }
 0x8d4   : > { %1034 = vrot.lane.b32.xlu1 %v2629_v20, %s2391_s14 }
 0x8d8   : > { %1036 = vrot.lane.b32.xlu1 %v2631_v25, %s2391_s14 }
 0x8dc   : > { %1267 = vrot.lane.b32.xlu1 %v1257_v16, %s2392_s24 }
 0x948   : > { %v1376_v32 = vpop.xlane.xlu0 %1375 }
 0x949   : > { %v1380_v40 = vsub.f32 %v1319_v24, %v1376_v32 }
 0x94b   : > { %v1382_v39 = vmul.f32 1.442695, %v1380_v40 }
 0x94c   : > { %v1379_v41 = vpop.xlane.xlu1 %1378 }
 0x94d   : > { %2336 = vpow2.f32 %v1382_v39  ;;  %v1381_v42 = vsub.f32 %v1369_v34, %v1379_v41  ;;  %v2302_v39 = vld [vmem:[%s2472_s20] sm:$0xff]   ;;  %v2303_v41 = vld [vmem:[%s2472_s20 + $0x8] sm:$0xff]  }
 0x94f   : > { %v1384_v43 = vmul.f32 1.442695, %v1381_v42  ;;  %v2304_v42 = vld [vmem:[%s2477_s23] sm:$0xff]  }
 0x950   : > { %v1399_v44 = vpop.permute.xlu1 %1398 }
 0x951   : > { %2338 = vpow2.f32 %v1384_v43  ;;  %v1404_v45 = vsel %vm715_vm4, %v1399_v44, 0  ;;  %v2305_v43 = vld [vmem:[%s2477_s23 + $0x8] sm:$0xff]   ;;  %v2306_v44 = vld [vmem:[%s2477_s23 + $0x10] sm:$0xff]  }
 0x952   : > { %2210 = vmatpush3.bf16.msra.mxu1 %v1404_v45  ;;  %v2307_v45 = vld [vmem:[%s2477_s23 + $0x18] sm:$0xff]  }
 0x953   : > { %2221 = vmatprep.subr.bf16.mxu1 %v2377_v4 }
 0x954   : > { %v1035_v52 = vpop.permute.xlu1 %1034 }
 0x955   : > { %1041 = vst.msk [vmem:[#allocation3] sm:$0xff] %vm1040_vm5, %v1035_v52  ;;  %v2308_v52 = vld [vmem:[%s2477_s23 + $0x20] sm:$0xff]  }
 0x957   : > { %v2337_v20 = vpop.eup %2336 }
 0x958   : > { %v1037_v25 = vpop.permute.xlu1 %1036  ;;  %v1386_v46 = vsel %vm589_vm3, %v2337_v20, 0.0 }
 0x959   : > { %1042 = vst.msk [vmem:[#allocation3 + $0x8] sm:$0xff] %vm1040_vm5, %v1037_v25  ;;  %1387 = vadd.xlane.f32.xlu0 %v1386_v46 }
 0x95b   : > { %v2339_v47 = vpop.eup %2338 }
 0x95c   : > { %v1268_v48 = vpop.permute.xlu1 %1267  ;;  %v1389_v49 = vsel %vm589_vm3, %v2339_v47, 0.0 }
 0x95d   : > { %1273 = vst.msk [vmem:[#allocation3 + $0x8] sm:$0xff] %vm1271_vm6, %v1268_v48  ;;  %1390 = vadd.xlane.f32.xlu0 %v1389_v49 }
 0x973   : > { %1446 = vrot.lane.b32.xlu0 %v2565_v53, %s2390_s10 }
 0x977   : > { %1265 = vrot.lane.b32.xlu0 %v1209_v12, %s2392_s24 }
 0x9e6   : > { %v1388_v50 = vpop.xlane.xlu0 %1387 }
 0x9e7   : > { %2340 = vrcp.f32 %v1388_v50 }
 0x9ea   : > { %v1391_v51 = vpop.xlane.xlu0 %1390 }
 0x9eb   : > { %2342 = vrcp.f32 %v1391_v51  ;;  %v1603_v51 = vsub.s32 5, %v2510_v9 }
 0x9ee   : > { %v1447_v54 = vpop.permute.xlu0 %1446 }
 0x9ef   : > { %v1452_v18 = vsel %vm715_vm4, %v1447_v54, 0 }
 0x9f0   : > { %2216 = vmatpush3.bf16.msra.mxu0 %v1452_v18  ;;  %v1604_v18 = vrot.slane %v2508_v8, %v1603_v51 }
 0x9f1   : > { %v2341_v21 = vpop.eup %2340  ;;  %2229 = vmatprep.subr.bf16.mxu0 %v2377_v4 }
 0x9f2   : > { %v1394_v55 = vmul.f32 %v2341_v21, %v2337_v20  ;;  %v1266_v31 = vpop.permute.xlu0 %1265  ;;  %v2309_v20 = vld [vmem:[%s2477_s23 + $0x28] sm:$0xff]  }
 0x9f3   : > { %1272 = vst.msk [vmem:[#allocation3] sm:$0xff] %vm1271_vm6, %v1266_v31 }
 0x9f4   : > { %v1396_v56 = vpack.c.bf16 %v1394_v55, %v1394_v55  ;;  %v1609_v55 = vsub.s32 6, %v2510_v9 }
 0x9f5   : > { %v2343_v53 = vpop.eup %2342 }
 0x9f6   : > { %v1395_v57 = vmul.f32 %v2343_v53, %v2339_v47  ;;  %2212 = vmatmul.mubr.msk.bf16.vlgmr.msra.gmra.mrb[24].mxu1 %vm589_vm3, %v1396_v56 }
 0x9f7   : > { %2225 = vmatprep.mubr.msk.bf16.mxu1 %vm2378_vm1, %v2377_v4  ;;  %2222 = vmatpush3.bf16.msra.mxu1 %v2300_v59 }
 0x9f8   : > { %v1397_v58 = vpack.c.bf16 %v1395_v57, %v1395_v57  ;;  %2223 = vmatprep.subr.bf16.mxu1 %v2377_v4  ;;  %v1610_v57 = vrot.slane %v2508_v8, %v1609_v55 }
 0x9fa   : > { %2218 = vmatmul.mubr.msk.bf16.vlgmr.msra.gmra.mrb[36].mxu0 %vm589_vm3, %v1397_v58 }
 0x9fb   : > { %2233 = vmatprep.mubr.msk.bf16.mxu0 %vm2378_vm1, %v2377_v4  ;;  %2224 = vmatpush3.bf16.msra.mxu1 %v2301_v60 }
 0x9fc   : > { %2237 = vmatprep.subr.bf16.mxu1 %v2377_v4  ;;  %2230 = vmatpush3.bf16.msra.mxu0 %v2302_v39 }
 0x9fd   : > { %2231 = vmatprep.subr.bf16.mxu0 %v2377_v4 }
 0xa00   : > { %2232 = vmatpush3.bf16.msra.mxu0 %v2303_v41 }
 0xac9   : > { %v1440_v61 = vpop.f32.mrb[24].mxu1 }
 0xaca   : > { %1496 = vrot.lane.b32.xlu0 %v1440_v61, %s2393_s25  ;;  %v2213_v62 = vpop.f32.mrb[25].mxu1 }
 0xacb   : > { %v1443_v63 = vpop.f32.mrb[26].mxu1  ;;  %v2310_v62 = vld [vmem:[%s2477_s23 + $0x30] sm:$0xff]  }
 0xacc   : > { %v2214_v0 = vpop.f32.mrb[27].mxu1  ;;  %v2311_v63 = vld [vmem:[%s2477_s23 + $0x38] sm:$0xff]  }
 0xacd   : > { %v1488_v1 = vpop.f32.mrb[36].mxu0  ;;  %v2046_v0 = vld [vmem:[%s453_s15] ss:$0 sm:$0xff] }
 0xace   : > { %1498 = vrot.lane.b32.xlu1 %v1488_v1, %s2393_s25  ;;  %v2219_v2 = vpop.f32.mrb[37].mxu0 }
 0xacf   : > { %v1491_v28 = vpop.f32.mrb[38].mxu0 }
 0xad0   : > { %v2220_v3 = vpop.f32.mrb[39].mxu0 }
 0xb3c   : > { %v1497_v5 = vpop.permute.xlu0 %1496 }
 0xb3d   : > { %1503 = vst.msk [vmem:[#allocation3] sm:$0xff] %vm1502_vm7, %v1497_v5 }
 0xb40   : > { %v1499_v10 = vpop.permute.xlu1 %1498 }
 0xb41   : > { %1504 = vst.msk [vmem:[#allocation3 + $0x8] sm:$0xff] %vm1502_vm7, %v1499_v10 }
 0xb44   : > { %v1505_v11 = vld [vmem:[#allocation3] sm:$0xff] }
 0xb48   : > { %v1506_v12 = vld [vmem:[#allocation3 + $0x8] sm:$0xff] }
 0xb49   : > { %v1507_v13 = vpack.c.bf16 %v1506_v12, %v1505_v11 }
 0xb4b   : > { %2226 = vmatmul.mubr.msk.bf16.vlgmr.msra.gmra.mrb[28].mxu1 %vm495_vm2, %v1507_v13 }
 0xb4c   : > { %2253 = vmatprep.mubr.msk.bf16.mxu1 %vm2378_vm1, %v2377_v4  ;;  %2238 = vmatpush3.bf16.msra.mxu1 %v2304_v42 }
 0xb4d   : > { %2239 = vmatprep.subr.bf16.mxu1 %v2377_v4 }
 0xb50   : > { %2240 = vmatpush3.bf16.msra.mxu1 %v2305_v43 }
 0xb51   : > { %2241 = vmatprep.subr.bf16.mxu1 %v2377_v4 }
 0xb54   : > { %2242 = vmatpush3.bf16.msra.mxu1 %v2306_v44  ;;  %v1823_v44 = vsub.s32 7, %v2510_v9 }
 0xb55   : > { %2243 = vmatprep.subr.bf16.mxu1 %v2377_v4 }
 0xb58   : > { %2244 = vmatpush3.bf16.msra.mxu1 %v2307_v45  ;;  %v2352_v45 = vld [vmem:[%s2482_s26] sm:$0xff] }
 0xb59   : > { %2245 = vmatprep.subr.bf16.mxu1 %v2377_v4 }
 0xb5c   : > { %2246 = vmatpush3.bf16.msra.mxu1 %v2308_v52  ;;  %v1824_v52 = vrot.slane %v2352_v45, %v1823_v44 }
 0xb5d   : > { %2247 = vmatprep.subr.bf16.mxu1 %v2377_v4 }
 0xb60   : > { %2248 = vmatpush3.bf16.msra.mxu1 %v2309_v20 }
 0xb61   : > { %2249 = vmatprep.subr.bf16.mxu1 %v2377_v4 }
 0xb64   : > { %2250 = vmatpush3.bf16.msra.mxu1 %v2310_v62 }
 0xb65   : > { %2251 = vmatprep.subr.bf16.mxu1 %v2377_v4  ;;  %v1703_v4 = vrot.slane %v2508_v8, %v1702_v14 }
 0xb68   : > { %2252 = vmatpush3.bf16.msra.mxu1 %v2311_v63 }
 0xc1e   : > { %v1565_v16 = vpop.f32.mrb[28].mxu1 }
 0xc1f   : > { %v1566_v17 = vadd.f32 %v1565_v16, %v1515_v15  ;;  %v2227_v19 = vpop.f32.mrb[29].mxu1 }
 0xc20   : > { %v1568_v22 = vpop.f32.mrb[30].mxu1 }
 0xc21   : > { %v1569_v23 = vadd.f32 %v1568_v22, %v1515_v15  ;;  %v2228_v24 = vpop.f32.mrb[31].mxu1  ;;  %v1572_v26 = vadd.f32 %v1566_v17, %v2503_v6 }
 0xc23   : > { %v1574_v27 = vsel %vm495_vm2, %v1572_v26, 0.0  ;;  %v1573_v29 = vadd.f32 %v1569_v23, %v2505_v7 }
 0xc24   : > { %1575 = vadd.xlane.f32.xlu0 %v1574_v27 }
 0xc25   : > { %v1577_v30 = vsel %vm495_vm2, %v1573_v29, 0.0 }
 0xc26   : > { %1578 = vadd.xlane.f32.xlu1 %v1577_v30 }
 0xcb1   : > { %v1576_v33 = vpop.xlane.xlu0 %1575 }
 0xcb2   : > { %v1581_v34 = vmul.f32 0.03125, %v1576_v33 }
 0xcb3   : > { %v1579_v35 = vpop.xlane.xlu1 %1578 }
 0xcb4   : > { %v1583_v36 = vsub.f32 %v1572_v26, %v1581_v34  ;;  %v1582_v37 = vmul.f32 0.03125, %v1579_v35 }
 0xcb6   : > { %v1584_v38 = vsub.f32 %v1573_v29, %v1582_v37  ;;  %v1585_v32 = vmul.f32 %v1583_v36, %v1583_v36 }
 0xcb8   : > { %v1587_v6 = vsel %vm495_vm2, %v1585_v32, 0.0  ;;  %v1586_v40 = vmul.f32 %v1584_v38, %v1584_v38 }
 0xcb9   : > { %1588 = vadd.xlane.f32.xlu0 %v1587_v6 }
 0xcba   : > { %v1590_v7 = vsel %vm495_vm2, %v1586_v40, 0.0 }
 0xcbd   : > { %1591 = vadd.xlane.f32.xlu0 %v1590_v7 }
 0xd46   : > { %v1589_v25 = vpop.xlane.xlu0 %1588 }
 0xd47   : > { %v1593_v46 = vmul.f32 0.03125, %v1589_v25 }
 0xd49   : > { %v1595_v47 = vadd.f32 1e-05, %v1593_v46 }
 0xd4a   : > { %v1592_v48 = vpop.xlane.xlu0 %1591 }
 0xd4b   : > { %2344 = vrsqrt.f32 %v1595_v47  ;;  %v1594_v49 = vmul.f32 0.03125, %v1592_v48  ;;  %v2058_v47 = vld [vmem:[%s2482_s26 + $0x8] ss:$0 sm:$0xff] }
 0xd4d   : > { %v1596_v50 = vadd.f32 1e-05, %v1594_v49 }
 0xd4f   : > { %2346 = vrsqrt.f32 %v1596_v50 }
 0xd55   : > { %v2345_v54 = vpop.eup %2344 }
 0xd56   : > { %v1599_v21 = vmul.f32 %v2345_v54, %v1583_v36 }
 0xd58   : > { %v1605_v56 = vmul.f32 %v1604_v18, %v1599_v21 }
 0xd59   : > { %v2347_v31 = vpop.eup %2346 }
 0xd5a   : > { %v1600_v53 = vmul.f32 %v2347_v31, %v1584_v38  ;;  %v1611_v59 = vadd.f32 %v1610_v57, %v1605_v56 }
 0xd5c   : > { %v1606_v58 = vmul.f32 %v1604_v18, %v1600_v53 }
 0xd5e   : > { %v1612_v60 = vadd.f32 %v1610_v57, %v1606_v58 }
 0xd60   : > { %v1613_v61 = vpack.c.bf16 %v1612_v60, %v1611_v59 }
 0xd62   : > { %2234 = vmatmul.mubr.msk.bf16.vlgmr.msra.gmra.mrb[40].mxu0 %vm495_vm2, %v1613_v61 }
 0xe35   : > { %v1674_v1 = vpop.f32.mrb[40].mxu0 }
 0xe36   : > { %v1675_v2 = vadd.f32 %v2046_v0, %v1674_v1  ;;  %v2235_v28 = vpop.f32.mrb[41].mxu0 }
 0xe37   : > { %v1677_v3 = vpop.f32.mrb[42].mxu0 }
 0xe38   : > { %v1678_v5 = vadd.f32 %v2046_v0, %v1677_v3  ;;  %v2236_v10 = vpop.f32.mrb[43].mxu0  ;;  %v1681_v11 = vmax.f32 %v1675_v2, 0.0 }
 0xe3a   : > { %v1682_v12 = vmax.f32 %v1678_v5, 0.0 }
 0xe3c   : > { %v1683_v13 = vpack.c.bf16 %v1682_v12, %v1681_v11 }
 0xe3e   : > { %2254 = vmatmul.mubr.bf16.vlgmr.msra.gmra.mrb[32].mxu1 %v1683_v13 }
 0xf11   : > { %v1786_v15 = vpop.f32.mrb[32].mxu1 }
 0xf12   : > { %v1787_v16 = vadd.f32 %v1786_v15, %v1703_v4  ;;  %v2255_v17 = vpop.f32.mrb[33].mxu1 }
 0xf13   : > { %v1789_v19 = vpop.f32.mrb[34].mxu1 }
 0xf14   : > { %v1790_v22 = vadd.f32 %v1789_v19, %v1703_v4  ;;  %v2256_v23 = vpop.f32.mrb[35].mxu1  ;;  %v1793_v24 = vadd.f32 %v1787_v16, %v1611_v59 }
 0xf16   : > { %v1795_v26 = vsel %vm495_vm2, %v1793_v24, 0.0  ;;  %v1794_v27 = vadd.f32 %v1790_v22, %v1612_v60 }
 0xf17   : > { %1796 = vadd.xlane.f32.xlu1 %v1795_v26 }
 0xf18   : > { %v1798_v29 = vsel %vm495_vm2, %v1794_v27, 0.0 }
 0xf19   : > { %1799 = vadd.xlane.f32.xlu0 %v1798_v29 }
 0xfa4   : > { %v1797_v30 = vpop.xlane.xlu1 %1796 }
 0xfa5   : > { %v1801_v33 = vmul.f32 0.03125, %v1797_v30 }
 0xfa6   : > { %v1800_v34 = vpop.xlane.xlu0 %1799 }
 0xfa7   : > { %v1803_v35 = vsub.f32 %v1793_v24, %v1801_v33  ;;  %v1802_v36 = vmul.f32 0.03125, %v1800_v34 }
 0xfa9   : > { %v1804_v8 = vsub.f32 %v1794_v27, %v1802_v36  ;;  %v1805_v37 = vmul.f32 %v1803_v35, %v1803_v35 }
 0xfab   : > { %v1807_v38 = vsel %vm495_vm2, %v1805_v37, 0.0  ;;  %v1806_v32 = vmul.f32 %v1804_v8, %v1804_v8 }
 0xfac   : > { %1808 = vadd.xlane.f32.xlu1 %v1807_v38 }
 0xfad   : > { %v1810_v6 = vsel %vm495_vm2, %v1806_v32, 0.0 }
 0xfae   : > { %1811 = vadd.xlane.f32.xlu0 %v1810_v6 }
0x1039   : > { %v1809_v40 = vpop.xlane.xlu1 %1808 }
0x103a   : > { %v1813_v7 = vmul.f32 0.03125, %v1809_v40 }
0x103b   : > { %v1812_v39 = vpop.xlane.xlu0 %1811 }
0x103c   : > { %v1815_v41 = vadd.f32 1e-05, %v1813_v7  ;;  %v1814_v42 = vmul.f32 0.03125, %v1812_v39 }
0x103e   : > { %2348 = vrsqrt.f32 %v1815_v41  ;;  %v1816_v43 = vadd.f32 1e-05, %v1814_v42 }
0x1040   : > { %2350 = vrsqrt.f32 %v1816_v43 }
0x1048   : > { %v2349_v20 = vpop.eup %2348 }
0x1049   : > { %v1819_v25 = vmul.f32 %v2349_v20, %v1803_v35 }
0x104a   : > { %v2351_v46 = vpop.eup %2350 }
0x104b   : > { %v1825_v48 = vmul.f32 %v1824_v52, %v1819_v25  ;;  %v1820_v49 = vmul.f32 %v2351_v46, %v1804_v8 }
0x104d   : > { %v1831_v50 = vadd.f32 %v2058_v47, %v1825_v48  ;;  %v1826_v51 = vmul.f32 %v1824_v52, %v1820_v49 }
0x104f   : > { %1833 = vst.msk [vmem:[#allocation2] sm:$0xff] %vm495_vm2, %v1831_v50  ;;  %1835 = vst.msk [vmem:[%s2491_s18] sm:$0xff] %vm495_vm2, %v1831_v50  ;;  %v1832_v54 = vadd.f32 %v2058_v47, %v1826_v51 }
0x1051   : > { %1834 = vst.msk [vmem:[#allocation2 + $0x8] sm:$0xff] %vm495_vm2, %v1832_v54  ;;  %1836 = vst.msk [vmem:[%s2491_s18 + $0x8] sm:$0xff] %vm495_vm2, %v1832_v54 }
0x1052 PF: > { %s18_s29 = sadd.s32 1, %s2375_s29   ;;  %s2767_s27 = smov %s2371_s28 }
0x1053   : > { %p15_p6 = scmp.ge.s32.totalorder %s18_s29, 4   ;;  %s2768_s28 = smov %s2770_s30 }
0x1055   :  { %17 = sbr.rel (!%p15_p6) target bundleno = 2 (0x2), region = 107 }

</bundles_post_ra>
